<compile_context>
chip_gen: v7x
topology: tpu7x:2x2x1
jax: 0.10.0
libtpu: 0.0.40
codegen_flags: <defaults>
</compile_context>

<pallas_src>
import functools

import jax
import jax.numpy as jnp
from jax import lax
from jax.experimental import pallas as pl
from jax.experimental.pallas import tpu as pltpu


def _round_up(x, m):
    return (x + m - 1) // m * m


# ---------------------------------------------------------------------------
# Kernel: one LSTM layer, one seq-chunk per grid step.
# ---------------------------------------------------------------------------
def _lstm_layer_kernel(*refs, chunk, batch_p, hid_p, write_outputs):
    if write_outputs:
        (x_ref, wih_ref, whh_ref, b_ref,
         out_ref, hN_ref, cN_ref, gx_scr) = refs
    else:
        (x_ref, wih_ref, whh_ref, b_ref,
         hN_ref, cN_ref, gx_scr) = refs
        out_ref = None

    # h/c are carried across grid steps inside the resident (constant-index)
    # output blocks; HBM writeback only happens once, after the last chunk.
    @pl.when(pl.program_id(0) == 0)
    def _():
        hN_ref[...] = jnp.zeros_like(hN_ref)
        cN_ref[...] = jnp.zeros_like(cN_ref)

    # ---- Phase 1: input projection for this chunk (one big MXU matmul) ----
    gx_scr[...] = (jnp.dot(x_ref[...], wih_ref[...],
                           preferred_element_type=jnp.float32)
                   + b_ref[...])

    whh = whh_ref[...]

    def sigmoid_t(z):
        # sigmoid(z) = 0.5 * (tanh(0.5 z) + 1): single EUP push per gate.
        return 0.5 * (jnp.tanh(0.5 * z) + 1.0)

    # ---- Phase 2: sequential recurrence over this chunk --------------------
    def step(t, carry):
        h_prev, c_prev = carry
        row = pl.multiple_of(t * batch_p, batch_p)
        gates = gx_scr[pl.ds(row, batch_p), :] + jnp.dot(
            h_prev, whh, preferred_element_type=jnp.float32)
        # Gate slices are 128-lane-tile aligned (hid_p % 128 == 0).
        i_g = sigmoid_t(gates[:, 0 * hid_p:1 * hid_p])
        f_g = sigmoid_t(gates[:, 1 * hid_p:2 * hid_p])
        g_g = jnp.tanh(gates[:, 2 * hid_p:3 * hid_p])
        o_g = sigmoid_t(gates[:, 3 * hid_p:4 * hid_p])
        c_new = f_g * c_prev + i_g * g_g
        h_new = o_g * jnp.tanh(c_new)
        if write_outputs:
            out_ref[pl.ds(row, batch_p), :] = h_new   # stays in VMEM out block
        return h_new, c_new

    h0 = hN_ref[...]
    c0 = cN_ref[...]
    h_last, c_last = lax.fori_loop(0, chunk, step, (h0, c0),
                                   unroll=min(chunk, 8))
    hN_ref[...] = h_last
    cN_ref[...] = c_last


# ---------------------------------------------------------------------------
# VMEM budgeting / chunk selection
# ---------------------------------------------------------------------------
def _physical_vmem_bytes():
    try:
        return int(pltpu.get_tpu_info().vmem_capacity_bytes)
    except Exception:
        return 64 << 20          # conservative fallback: v7x per-core VMEM


def _layer_vmem_need(chunk, batch_p, in_dim, hid_p, write_outputs):
    f32 = 4
    weights = (in_dim * 4 * hid_p + hid_p * 4 * hid_p + 4 * hid_p) * f32
    x_blk = chunk * batch_p * in_dim * f32
    out_blk = chunk * batch_p * hid_p * f32 if write_outputs else 0
    hc_blk = 2 * batch_p * hid_p * f32
    gx = chunk * batch_p * 4 * hid_p * f32
    # Default double-buffering on every pipelined operand; gx scratch single.
    return 2 * (weights + x_blk + out_blk + hc_blk) + gx


def _pick_chunk(seq, batch_p, in_dim, hid_p, write_outputs, budget):
    # Largest divisor of seq whose working set fits the VMEM budget.
    for t in range(seq, 0, -1):
        if seq % t:
            continue
        if _layer_vmem_need(t, batch_p, in_dim, hid_p, write_outputs) <= budget:
            return t
    return 1


# ---------------------------------------------------------------------------
# One LSTM layer (all timesteps) as a single pallas_call
# ---------------------------------------------------------------------------
def lstm_layer(x2d, w_ih_t, w_hh_t, bias, *, seq, batch_p, hid_p,
               write_outputs):
    """x2d: (seq*batch_p, in_dim) f32; w_ih_t: (in_dim, 4*hid_p);
    w_hh_t: (hid_p, 4*hid_p); bias: (1, 4*hid_p).
    Returns (out2d, h_N, c_N) if write_outputs else (h_N, c_N)."""
    total, in_dim = x2d.shape
    assert total == seq * batch_p

    budget = _physical_vmem_bytes() * 3 // 4     # ~48 MiB v7x, ~96 MiB v5e/v6e
    chunk = _pick_chunk(seq, batch_p, in_dim, hid_p, write_outputs, budget)
    need = _layer_vmem_need(chunk, batch_p, in_dim, hid_p, write_outputs)
    vmem_limit = int(min(budget, max(16 << 20, need + (4 << 20))))

    kernel = functools.partial(
        _lstm_layer_kernel, chunk=chunk, batch_p=batch_p, hid_p=hid_p,
        write_outputs=write_outputs)

    in_specs = [
        pl.BlockSpec((chunk * batch_p, in_dim), lambda i: (i, 0)),
        pl.BlockSpec((in_dim, 4 * hid_p), lambda i: (0, 0)),
        pl.BlockSpec((hid_p, 4 * hid_p), lambda i: (0, 0)),
        pl.BlockSpec((1, 4 * hid_p), lambda i: (0, 0)),
    ]
    hc_spec = pl.BlockSpec((batch_p, hid_p), lambda i: (0, 0))
    hc_shape = jax.ShapeDtypeStruct((batch_p, hid_p), jnp.float32)
    if write_outputs:
        out_shape = (jax.ShapeDtypeStruct((seq * batch_p, hid_p), jnp.float32),
                     hc_shape, hc_shape)
        out_specs = [pl.BlockSpec((chunk * batch_p, hid_p), lambda i: (i, 0)),
                     hc_spec, hc_spec]
    else:
        out_shape = (hc_shape, hc_shape)
        out_specs = [hc_spec, hc_spec]

    grid_spec = pltpu.PrefetchScalarGridSpec(
        num_scalar_prefetch=0,
        grid=(seq // chunk,),
        in_specs=in_specs,
        out_specs=out_specs,
        scratch_shapes=[
            pltpu.VMEM((chunk * batch_p, 4 * hid_p), jnp.float32),  # gx stage
        ],
    )
    return pl.pallas_call(
        kernel,
        out_shape=out_shape,
        grid_spec=grid_spec,
        compiler_params=pltpu.CompilerParams(
            dimension_semantics=("arbitrary",),      # serial recurrence in time
            vmem_limit_bytes=vmem_limit,
        ),
    )(x2d, w_ih_t, w_hh_t, bias)


# ---------------------------------------------------------------------------
# Parameters
# ---------------------------------------------------------------------------
def _pad_gate_cols(w_t, hid, hid_p):
    """(rows, 4*hid) -> (rows, 4*hid_p); gate g moves to cols [g*hid_p, g*hid_p+hid)."""
    rows = w_t.shape[0]
    out = jnp.zeros((rows, 4 * hid_p), w_t.dtype)
    for g in range(4):
        out = out.at[:, g * hid_p:g * hid_p + hid].set(
            w_t[:, g * hid:(g + 1) * hid])
    return out


def init_encoder_params(key, input_dim, emb_dim, hid_dim, num_layers):
    """Deterministic parameter init matching the shapes of the PyTorch module."""
    hid_p = _round_up(hid_dim, 128)
    keys = jax.random.split(key, 1 + 4 * num_layers)
    params = {"hid_p": hid_p}
    params["embedding"] = jax.random.normal(
        keys[0], (input_dim, emb_dim), jnp.float32) * 0.1
    layers = []
    kidx = 1
    for layer in range(num_layers):
        in_dim = emb_dim if layer == 0 else hid_dim
        in_dim_p = emb_dim if layer == 0 else hid_p
        scale = 1.0 / float(hid_dim) ** 0.5
        w_ih = jax.random.uniform(keys[kidx], (4 * hid_dim, in_dim),
                                  jnp.float32, -scale, scale); kidx += 1
        w_hh = jax.random.uniform(keys[kidx], (4 * hid_dim, hid_dim),
                                  jnp.float32, -scale, scale); kidx += 1
        b_ih = jax.random.uniform(keys[kidx], (4 * hid_dim,),
                                  jnp.float32, -scale, scale); kidx += 1
        b_hh = jax.random.uniform(keys[kidx], (4 * hid_dim,),
                                  jnp.float32, -scale, scale); kidx += 1

        w_ih_t = w_ih.T                        # (in_dim, 4*hid)
        w_hh_t = w_hh.T                        # (hid, 4*hid)
        bias = (b_ih + b_hh)[None, :]          # (1, 4*hid), PyTorch bias folding

        # Lane-aligned kernel weights: each gate owns its own hid_p column
        # tile; padded rows/cols are zero, which keeps padded h/c lanes at
        # exactly zero (mathematically exact).
        w_ih_t_pad = _pad_gate_cols(w_ih_t, hid_dim, hid_p)
        if in_dim_p != in_dim:
            w_ih_t_pad = jnp.pad(w_ih_t_pad, ((0, in_dim_p - in_dim), (0, 0)))
        w_hh_t_pad = jnp.pad(_pad_gate_cols(w_hh_t, hid_dim, hid_p),
                             ((0, hid_p - hid_dim), (0, 0)))
        bias_pad = _pad_gate_cols(bias, hid_dim, hid_p)

        layers.append({
            "w_ih_t": w_ih_t_pad,              # (in_dim_p, 4*hid_p)
            "w_hh_t": w_hh_t_pad,              # (hid_p, 4*hid_p)
            "bias": bias_pad,                  # (1, 4*hid_p)
            "ref": {"w_ih_t": w_ih_t, "w_hh_t": w_hh_t, "bias": bias},
        })
    params["layers"] = layers
    return params


# ---------------------------------------------------------------------------
# Forward
# ---------------------------------------------------------------------------
def encoder_forward(params, src, hid_dim):
    """src: (seq_len, batch) int32.  Returns (hidden, cell), each
    (num_layers, batch, hid_dim) — matching PyTorch nn.LSTM."""
    seq, batch = src.shape
    hid_p = params["hid_p"]
    batch_p = _round_up(batch, 8)

    # Embedding lookup (glue, plain JAX gather).
    # TODO(synk): training-mode stochastic dropout omitted (eval identity).
    x = jnp.take(params["embedding"], src, axis=0)        # (seq, batch, emb)
    if batch_p != batch:
        x = jnp.pad(x, ((0, 0), (0, batch_p - batch), (0, 0)))
    x2d = x.reshape(seq * batch_p, x.shape[-1])            # flatten wrapper-side

    hiddens, cells = [], []
    n_layers = len(params["layers"])
    for li, lp in enumerate(params["layers"]):
        is_last = li == n_layers - 1
        if is_last:
            # Final layer: skip the full per-timestep output writeback.
            h_n, c_n = lstm_layer(x2d, lp["w_ih_t"], lp["w_hh_t"], lp["bias"],
                                  seq=seq, batch_p=batch_p, hid_p=hid_p,
                                  write_outputs=False)
        else:
            x2d, h_n, c_n = lstm_layer(x2d, lp["w_ih_t"], lp["w_hh_t"],
                                       lp["bias"], seq=seq, batch_p=batch_p,
                                       hid_p=hid_p, write_outputs=True)
        hiddens.append(h_n[:batch, :hid_dim])
        cells.append(c_n[:batch, :hid_dim])
    hidden = jnp.stack(hiddens, axis=0)        # (num_layers, batch, hid)
    cell = jnp.stack(cells, axis=0)            # (num_layers, batch, hid)
    return hidden, cell


# ---------------------------------------------------------------------------
# Pure-JAX reference (correctness check, unpadded weights)
# ---------------------------------------------------------------------------
def _encoder_reference(params, src, hid_dim):
    x = jnp.take(params["embedding"], src, axis=0)
    hiddens, cells = [], []
    for lp in params["layers"]:
        r = lp["ref"]
        seq, batch, _ = x.shape

        def step(carry, x_t, r=r):
            h, c = carry
            g = x_t @ r["w_ih_t"] + h @ r["w_hh_t"] + r["bias"]
            i = jax.nn.sigmoid(g[:, 0 * hid_dim:1 * hid_dim])
            f = jax.nn.sigmoid(g[:, 1 * hid_dim:2 * hid_dim])
            gg = jnp.tanh(g[:, 2 * hid_dim:3 * hid_dim])
            o = jax.nn.sigmoid(g[:, 3 * hid_dim:4 * hid_dim])
            c_new = f * c + i * gg
            h_new = o * jnp.tanh(c_new)
            return (h_new, c_new), h_new

        init = (jnp.zeros((batch, hid_dim), jnp.float32),
                jnp.zeros((batch, hid_dim), jnp.float32))
        (h_n, c_n), outs = lax.scan(step, init, x)
        x = outs
        hiddens.append(h_n)
        cells.append(c_n)
    return jnp.stack(hiddens, 0), jnp.stack(cells, 0)


if __name__ == "__main__":
    INPUT_DIM = 16     # vocab size
    EMB_DIM = 32
    HID_DIM = 32
    NUM_LAYERS = 2
    SEQ_LEN = 8
    BATCH = 2

    key = jax.random.PRNGKey(0)
    pkey, dkey = jax.random.split(key)
    params = init_encoder_params(pkey, INPUT_DIM, EMB_DIM, HID_DIM, NUM_LAYERS)
    src = jax.random.randint(dkey, (SEQ_LEN, BATCH), 0, INPUT_DIM, jnp.int32)

    hidden, cell = encoder_forward(params, src, HID_DIM)
    jax.block_until_ready((hidden, cell))

    assert hidden.shape == (NUM_LAYERS, BATCH, HID_DIM)
    assert cell.shape == (NUM_LAYERS, BATCH, HID_DIM)

    h_ref, c_ref = _encoder_reference(params, src, HID_DIM)
    assert jnp.allclose(hidden, h_ref, atol=1e-4, rtol=1e-4)
    assert jnp.allclose(cell, c_ref, atol=1e-4, rtol=1e-4)

    print("KERNEL_OK")
</pallas_src>

<mosaic_0001>
module attributes {stable_mosaic.version = 11 : i64} {
  func.func @_lstm_layer_kernel(%arg0: i32, %arg1: memref<64x32xf32, #tpu.memory_space<vmem>>, %arg2: memref<32x512xf32, #tpu.memory_space<vmem>>, %arg3: memref<128x512xf32, #tpu.memory_space<vmem>>, %arg4: memref<1x512xf32, #tpu.memory_space<vmem>>, %arg5: memref<64x128xf32, #tpu.memory_space<vmem>>, %arg6: memref<8x128xf32, #tpu.memory_space<vmem>>, %arg7: memref<8x128xf32, #tpu.memory_space<vmem>>, %arg8: memref<64x512xf32, #tpu.memory_space<vmem>>) attributes {dimension_semantics = [#tpu.dimension_semantics<arbitrary>], iteration_bounds = array<i64: 1>, scalar_prefetch = 0 : i64, scratch_operands = 1 : i64, tpu.core_type = #tpu.core_type<tc>, window_params = [{transform_indices = @transform_0, window_bounds = array<i64: 64, 32>}, {pipeline_mode = #tpu.pipeline_mode<synchronous>, transform_indices = @transform_1, window_bounds = array<i64: 32, 512>}, {pipeline_mode = #tpu.pipeline_mode<synchronous>, transform_indices = @transform_2, window_bounds = array<i64: 128, 512>}, {pipeline_mode = #tpu.pipeline_mode<synchronous>, transform_indices = @transform_3, window_bounds = array<i64: 1, 512>}, {transform_indices = @transform_4, window_bounds = array<i64: 64, 128>}, {pipeline_mode = #tpu.pipeline_mode<synchronous>, transform_indices = @transform_5, window_bounds = array<i64: 8, 128>}, {pipeline_mode = #tpu.pipeline_mode<synchronous>, transform_indices = @transform_6, window_bounds = array<i64: 8, 128>}]} {
    %c0_i32 = arith.constant 0 : i32
    %0 = arith.cmpi eq, %arg0, %c0_i32 : i32
    %1 = arith.extui %0 : i1 to i32
    %c0_i32_0 = arith.constant 0 : i32
    %2 = arith.cmpi ne, %1, %c0_i32_0 : i32
    scf.if %2 {
      %cst_123 = arith.constant 0.000000e+00 : f32
      %327 = vector.broadcast %cst_123 : f32 to vector<8x128xf32>
      %c0_124 = arith.constant 0 : index
      %c0_125 = arith.constant 0 : index
      %328 = vector.load %arg6[%c0_124, %c0_125] : memref<8x128xf32, #tpu.memory_space<vmem>>, vector<8x128xf32>
      tpu.vector_store %arg6[%c0_124, %c0_125], %327 {strides = array<i32>} : memref<8x128xf32, #tpu.memory_space<vmem>>, vector<8x128xf32>,
      %cst_126 = arith.constant 0.000000e+00 : f32
      %329 = vector.broadcast %cst_126 : f32 to vector<8x128xf32>
      %c0_127 = arith.constant 0 : index
      %c0_128 = arith.constant 0 : index
      %330 = vector.load %arg7[%c0_127, %c0_128] : memref<8x128xf32, #tpu.memory_space<vmem>>, vector<8x128xf32>
      tpu.vector_store %arg7[%c0_127, %c0_128], %329 {strides = array<i32>} : memref<8x128xf32, #tpu.memory_space<vmem>>, vector<8x128xf32>,
    } else {
    }
    %c0 = arith.constant 0 : index
    %c0_1 = arith.constant 0 : index
    %3 = vector.load %arg1[%c0, %c0_1] : memref<64x32xf32, #tpu.memory_space<vmem>>, vector<64x32xf32>
    %c0_2 = arith.constant 0 : index
    %c0_3 = arith.constant 0 : index
    %4 = vector.load %arg2[%c0_2, %c0_3] : memref<32x512xf32, #tpu.memory_space<vmem>>, vector<32x512xf32>
    %cst = arith.constant dense<0.000000e+00> : vector<64x512xf32>
    %5 = tpu.matmul %3, %4, %cst {dimension_numbers = #tpu.dot_dimension_numbers<[1], [0], [0], [1], [0, 0, 1, 1], [], []>} : vector<64x32xf32>, vector<32x512xf32>, vector<64x512xf32> -> vector<64x512xf32>
    %c0_4 = arith.constant 0 : index
    %c0_5 = arith.constant 0 : index
    %6 = vector.load %arg4[%c0_4, %c0_5] : memref<1x512xf32, #tpu.memory_space<vmem>>, vector<1x512xf32>
    %7 = vector.broadcast %6 : vector<1x512xf32> to vector<64x512xf32>
    %8 = arith.addf %5, %7 : vector<64x512xf32>
    %c0_6 = arith.constant 0 : index
    %c0_7 = arith.constant 0 : index
    %9 = vector.load %arg8[%c0_6, %c0_7] : memref<64x512xf32, #tpu.memory_space<vmem>>, vector<64x512xf32>
    tpu.vector_store %arg8[%c0_6, %c0_7], %8 {strides = array<i32>} : memref<64x512xf32, #tpu.memory_space<vmem>>, vector<64x512xf32>,
    %c0_8 = arith.constant 0 : index
    %c0_9 = arith.constant 0 : index
    %10 = vector.load %arg3[%c0_8, %c0_9] : memref<128x512xf32, #tpu.memory_space<vmem>>, vector<128x512xf32>
    %c0_10 = arith.constant 0 : index
    %c0_11 = arith.constant 0 : index
    %11 = vector.load %arg6[%c0_10, %c0_11] : memref<8x128xf32, #tpu.memory_space<vmem>>, vector<8x128xf32>
    %c0_12 = arith.constant 0 : index
    %c0_13 = arith.constant 0 : index
    %12 = vector.load %arg7[%c0_12, %c0_13] : memref<8x128xf32, #tpu.memory_space<vmem>>, vector<8x128xf32>
    %c0_i32_14 = arith.constant 0 : i32
    %c8_i32 = arith.constant 8 : i32
    %13 = arith.muli %c0_i32_14, %c8_i32 : i32
    %14 = tpu.assume_multiple %13, 8 : i32
    %15 = arith.index_cast %14 : i32 to index
    %c0_15 = arith.constant 0 : index
    %16 = vector.load %arg8[%15, %c0_15] : memref<64x512xf32, #tpu.memory_space<vmem>>, vector<8x512xf32>
    %cst_16 = arith.constant dense<0.000000e+00> : vector<8x512xf32>
    %17 = tpu.matmul %11, %10, %cst_16 {dimension_numbers = #tpu.dot_dimension_numbers<[1], [0], [0], [1], [0, 0, 1, 1], [], []>} : vector<8x128xf32>, vector<128x512xf32>, vector<8x512xf32> -> vector<8x512xf32>
    %18 = arith.addf %16, %17 : vector<8x512xf32>
    %19 = vector.extract_strided_slice %18 {offsets = [0, 0], sizes = [8, 128], strides = [1, 1]} : vector<8x512xf32> to vector<8x128xf32>
    %cst_17 = arith.constant 5.000000e-01 : f32
    %20 = vector.broadcast %cst_17 : f32 to vector<8x128xf32>
    %21 = arith.mulf %20, %19 : vector<8x128xf32>
    %22 = math.tanh %21 : vector<8x128xf32>
    %cst_18 = arith.constant 1.000000e+00 : f32
    %23 = vector.broadcast %cst_18 : f32 to vector<8x128xf32>
    %24 = arith.addf %22, %23 : vector<8x128xf32>
    %cst_19 = arith.constant 5.000000e-01 : f32
    %25 = vector.broadcast %cst_19 : f32 to vector<8x128xf32>
    %26 = arith.mulf %25, %24 : vector<8x128xf32>
    %27 = vector.extract_strided_slice %18 {offsets = [0, 128], sizes = [8, 128], strides = [1, 1]} : vector<8x512xf32> to vector<8x128xf32>
    %cst_20 = arith.constant 5.000000e-01 : f32
    %28 = vector.broadcast %cst_20 : f32 to vector<8x128xf32>
    %29 = arith.mulf %28, %27 : vector<8x128xf32>
    %30 = math.tanh %29 : vector<8x128xf32>
    %cst_21 = arith.constant 1.000000e+00 : f32
    %31 = vector.broadcast %cst_21 : f32 to vector<8x128xf32>
    %32 = arith.addf %30, %31 : vector<8x128xf32>
    %cst_22 = arith.constant 5.000000e-01 : f32
    %33 = vector.broadcast %cst_22 : f32 to vector<8x128xf32>
    %34 = arith.mulf %33, %32 : vector<8x128xf32>
    %35 = vector.extract_strided_slice %18 {offsets = [0, 256], sizes = [8, 128], strides = [1, 1]} : vector<8x512xf32> to vector<8x128xf32>
    %36 = math.tanh %35 : vector<8x128xf32>
    %37 = vector.extract_strided_slice %18 {offsets = [0, 384], sizes = [8, 128], strides = [1, 1]} : vector<8x512xf32> to vector<8x128xf32>
    %cst_23 = arith.constant 5.000000e-01 : f32
    %38 = vector.broadcast %cst_23 : f32 to vector<8x128xf32>
    %39 = arith.mulf %38, %37 : vector<8x128xf32>
    %40 = math.tanh %39 : vector<8x128xf32>
    %cst_24 = arith.constant 1.000000e+00 : f32
    %41 = vector.broadcast %cst_24 : f32 to vector<8x128xf32>
    %42 = arith.addf %40, %41 : vector<8x128xf32>
    %cst_25 = arith.constant 5.000000e-01 : f32
    %43 = vector.broadcast %cst_25 : f32 to vector<8x128xf32>
    %44 = arith.mulf %43, %42 : vector<8x128xf32>
    %45 = arith.mulf %34, %12 : vector<8x128xf32>
    %46 = arith.mulf %26, %36 : vector<8x128xf32>
    %47 = arith.addf %45, %46 : vector<8x128xf32>
    %48 = math.tanh %47 : vector<8x128xf32>
    %49 = arith.mulf %44, %48 : vector<8x128xf32>
    %50 = arith.index_cast %14 : i32 to index
    %c0_26 = arith.constant 0 : index
    %51 = vector.load %arg5[%50, %c0_26] : memref<64x128xf32, #tpu.memory_space<vmem>>, vector<8x128xf32>
    tpu.vector_store %arg5[%50, %c0_26], %49 {strides = array<i32>} : memref<64x128xf32, #tpu.memory_space<vmem>>, vector<8x128xf32>,
    %c1_i32 = arith.constant 1 : i32
    %c8_i32_27 = arith.constant 8 : i32
    %52 = arith.muli %c1_i32, %c8_i32_27 : i32
    %53 = tpu.assume_multiple %52, 8 : i32
    %54 = arith.index_cast %53 : i32 to index
    %c0_28 = arith.constant 0 : index
    %55 = vector.load %arg8[%54, %c0_28] : memref<64x512xf32, #tpu.memory_space<vmem>>, vector<8x512xf32>
    %cst_29 = arith.constant dense<0.000000e+00> : vector<8x512xf32>
    %56 = tpu.matmul %49, %10, %cst_29 {dimension_numbers = #tpu.dot_dimension_numbers<[1], [0], [0], [1], [0, 0, 1, 1], [], []>} : vector<8x128xf32>, vector<128x512xf32>, vector<8x512xf32> -> vector<8x512xf32>
    %57 = arith.addf %55, %56 : vector<8x512xf32>
    %58 = vector.extract_strided_slice %57 {offsets = [0, 0], sizes = [8, 128], strides = [1, 1]} : vector<8x512xf32> to vector<8x128xf32>
    %cst_30 = arith.constant 5.000000e-01 : f32
    %59 = vector.broadcast %cst_30 : f32 to vector<8x128xf32>
    %60 = arith.mulf %59, %58 : vector<8x128xf32>
    %61 = math.tanh %60 : vector<8x128xf32>
    %cst_31 = arith.constant 1.000000e+00 : f32
    %62 = vector.broadcast %cst_31 : f32 to vector<8x128xf32>
    %63 = arith.addf %61, %62 : vector<8x128xf32>
    %cst_32 = arith.constant 5.000000e-01 : f32
    %64 = vector.broadcast %cst_32 : f32 to vector<8x128xf32>
    %65 = arith.mulf %64, %63 : vector<8x128xf32>
    %66 = vector.extract_strided_slice %57 {offsets = [0, 128], sizes = [8, 128], strides = [1, 1]} : vector<8x512xf32> to vector<8x128xf32>
    %cst_33 = arith.constant 5.000000e-01 : f32
    %67 = vector.broadcast %cst_33 : f32 to vector<8x128xf32>
    %68 = arith.mulf %67, %66 : vector<8x128xf32>
    %69 = math.tanh %68 : vector<8x128xf32>
    %cst_34 = arith.constant 1.000000e+00 : f32
    %70 = vector.broadcast %cst_34 : f32 to vector<8x128xf32>
    %71 = arith.addf %69, %70 : vector<8x128xf32>
    %cst_35 = arith.constant 5.000000e-01 : f32
    %72 = vector.broadcast %cst_35 : f32 to vector<8x128xf32>
    %73 = arith.mulf %72, %71 : vector<8x128xf32>
    %74 = vector.extract_strided_slice %57 {offsets = [0, 256], sizes = [8, 128], strides = [1, 1]} : vector<8x512xf32> to vector<8x128xf32>
    %75 = math.tanh %74 : vector<8x128xf32>
    %76 = vector.extract_strided_slice %57 {offsets = [0, 384], sizes = [8, 128], strides = [1, 1]} : vector<8x512xf32> to vector<8x128xf32>
    %cst_36 = arith.constant 5.000000e-01 : f32
    %77 = vector.broadcast %cst_36 : f32 to vector<8x128xf32>
    %78 = arith.mulf %77, %76 : vector<8x128xf32>
    %79 = math.tanh %78 : vector<8x128xf32>
    %cst_37 = arith.constant 1.000000e+00 : f32
    %80 = vector.broadcast %cst_37 : f32 to vector<8x128xf32>
    %81 = arith.addf %79, %80 : vector<8x128xf32>
    %cst_38 = arith.constant 5.000000e-01 : f32
    %82 = vector.broadcast %cst_38 : f32 to vector<8x128xf32>
    %83 = arith.mulf %82, %81 : vector<8x128xf32>
    %84 = arith.mulf %73, %47 : vector<8x128xf32>
    %85 = arith.mulf %65, %75 : vector<8x128xf32>
    %86 = arith.addf %84, %85 : vector<8x128xf32>
    %87 = math.tanh %86 : vector<8x128xf32>
    %88 = arith.mulf %83, %87 : vector<8x128xf32>
    %89 = arith.index_cast %53 : i32 to index
    %c0_39 = arith.constant 0 : index
    %90 = vector.load %arg5[%89, %c0_39] : memref<64x128xf32, #tpu.memory_space<vmem>>, vector<8x128xf32>
    tpu.vector_store %arg5[%89, %c0_39], %88 {strides = array<i32>} : memref<64x128xf32, #tpu.memory_space<vmem>>, vector<8x128xf32>,
    %c2_i32 = arith.constant 2 : i32
    %c8_i32_40 = arith.constant 8 : i32
    %91 = arith.muli %c2_i32, %c8_i32_40 : i32
    %92 = tpu.assume_multiple %91, 8 : i32
    %93 = arith.index_cast %92 : i32 to index
    %c0_41 = arith.constant 0 : index
    %94 = vector.load %arg8[%93, %c0_41] : memref<64x512xf32, #tpu.memory_space<vmem>>, vector<8x512xf32>
    %cst_42 = arith.constant dense<0.000000e+00> : vector<8x512xf32>
    %95 = tpu.matmul %88, %10, %cst_42 {dimension_numbers = #tpu.dot_dimension_numbers<[1], [0], [0], [1], [0, 0, 1, 1], [], []>} : vector<8x128xf32>, vector<128x512xf32>, vector<8x512xf32> -> vector<8x512xf32>
    %96 = arith.addf %94, %95 : vector<8x512xf32>
    %97 = vector.extract_strided_slice %96 {offsets = [0, 0], sizes = [8, 128], strides = [1, 1]} : vector<8x512xf32> to vector<8x128xf32>
    %cst_43 = arith.constant 5.000000e-01 : f32
    %98 = vector.broadcast %cst_43 : f32 to vector<8x128xf32>
    %99 = arith.mulf %98, %97 : vector<8x128xf32>
    %100 = math.tanh %99 : vector<8x128xf32>
    %cst_44 = arith.constant 1.000000e+00 : f32
    %101 = vector.broadcast %cst_44 : f32 to vector<8x128xf32>
    %102 = arith.addf %100, %101 : vector<8x128xf32>
    %cst_45 = arith.constant 5.000000e-01 : f32
    %103 = vector.broadcast %cst_45 : f32 to vector<8x128xf32>
    %104 = arith.mulf %103, %102 : vector<8x128xf32>
    %105 = vector.extract_strided_slice %96 {offsets = [0, 128], sizes = [8, 128], strides = [1, 1]} : vector<8x512xf32> to vector<8x128xf32>
    %cst_46 = arith.constant 5.000000e-01 : f32
    %106 = vector.broadcast %cst_46 : f32 to vector<8x128xf32>
    %107 = arith.mulf %106, %105 : vector<8x128xf32>
    %108 = math.tanh %107 : vector<8x128xf32>
    %cst_47 = arith.constant 1.000000e+00 : f32
    %109 = vector.broadcast %cst_47 : f32 to vector<8x128xf32>
    %110 = arith.addf %108, %109 : vector<8x128xf32>
    %cst_48 = arith.constant 5.000000e-01 : f32
    %111 = vector.broadcast %cst_48 : f32 to vector<8x128xf32>
    %112 = arith.mulf %111, %110 : vector<8x128xf32>
    %113 = vector.extract_strided_slice %96 {offsets = [0, 256], sizes = [8, 128], strides = [1, 1]} : vector<8x512xf32> to vector<8x128xf32>
    %114 = math.tanh %113 : vector<8x128xf32>
    %115 = vector.extract_strided_slice %96 {offsets = [0, 384], sizes = [8, 128], strides = [1, 1]} : vector<8x512xf32> to vector<8x128xf32>
    %cst_49 = arith.constant 5.000000e-01 : f32
    %116 = vector.broadcast %cst_49 : f32 to vector<8x128xf32>
    %117 = arith.mulf %116, %115 : vector<8x128xf32>
    %118 = math.tanh %117 : vector<8x128xf32>
    %cst_50 = arith.constant 1.000000e+00 : f32
    %119 = vector.broadcast %cst_50 : f32 to vector<8x128xf32>
    %120 = arith.addf %118, %119 : vector<8x128xf32>
    %cst_51 = arith.constant 5.000000e-01 : f32
    %121 = vector.broadcast %cst_51 : f32 to vector<8x128xf32>
    %122 = arith.mulf %121, %120 : vector<8x128xf32>
    %123 = arith.mulf %112, %86 : vector<8x128xf32>
    %124 = arith.mulf %104, %114 : vector<8x128xf32>
    %125 = arith.addf %123, %124 : vector<8x128xf32>
    %126 = math.tanh %125 : vector<8x128xf32>
    %127 = arith.mulf %122, %126 : vector<8x128xf32>
    %128 = arith.index_cast %92 : i32 to index
    %c0_52 = arith.constant 0 : index
    %129 = vector.load %arg5[%128, %c0_52] : memref<64x128xf32, #tpu.memory_space<vmem>>, vector<8x128xf32>
    tpu.vector_store %arg5[%128, %c0_52], %127 {strides = array<i32>} : memref<64x128xf32, #tpu.memory_space<vmem>>, vector<8x128xf32>,
    %c3_i32 = arith.constant 3 : i32
    %c8_i32_53 = arith.constant 8 : i32
    %130 = arith.muli %c3_i32, %c8_i32_53 : i32
    %131 = tpu.assume_multiple %130, 8 : i32
    %132 = arith.index_cast %131 : i32 to index
    %c0_54 = arith.constant 0 : index
    %133 = vector.load %arg8[%132, %c0_54] : memref<64x512xf32, #tpu.memory_space<vmem>>, vector<8x512xf32>
    %cst_55 = arith.constant dense<0.000000e+00> : vector<8x512xf32>
    %134 = tpu.matmul %127, %10, %cst_55 {dimension_numbers = #tpu.dot_dimension_numbers<[1], [0], [0], [1], [0, 0, 1, 1], [], []>} : vector<8x128xf32>, vector<128x512xf32>, vector<8x512xf32> -> vector<8x512xf32>
    %135 = arith.addf %133, %134 : vector<8x512xf32>
    %136 = vector.extract_strided_slice %135 {offsets = [0, 0], sizes = [8, 128], strides = [1, 1]} : vector<8x512xf32> to vector<8x128xf32>
    %cst_56 = arith.constant 5.000000e-01 : f32
    %137 = vector.broadcast %cst_56 : f32 to vector<8x128xf32>
    %138 = arith.mulf %137, %136 : vector<8x128xf32>
    %139 = math.tanh %138 : vector<8x128xf32>
    %cst_57 = arith.constant 1.000000e+00 : f32
    %140 = vector.broadcast %cst_57 : f32 to vector<8x128xf32>
    %141 = arith.addf %139, %140 : vector<8x128xf32>
    %cst_58 = arith.constant 5.000000e-01 : f32
    %142 = vector.broadcast %cst_58 : f32 to vector<8x128xf32>
    %143 = arith.mulf %142, %141 : vector<8x128xf32>
    %144 = vector.extract_strided_slice %135 {offsets = [0, 128], sizes = [8, 128], strides = [1, 1]} : vector<8x512xf32> to vector<8x128xf32>
    %cst_59 = arith.constant 5.000000e-01 : f32
    %145 = vector.broadcast %cst_59 : f32 to vector<8x128xf32>
    %146 = arith.mulf %145, %144 : vector<8x128xf32>
    %147 = math.tanh %146 : vector<8x128xf32>
    %cst_60 = arith.constant 1.000000e+00 : f32
    %148 = vector.broadcast %cst_60 : f32 to vector<8x128xf32>
    %149 = arith.addf %147, %148 : vector<8x128xf32>
    %cst_61 = arith.constant 5.000000e-01 : f32
    %150 = vector.broadcast %cst_61 : f32 to vector<8x128xf32>
    %151 = arith.mulf %150, %149 : vector<8x128xf32>
    %152 = vector.extract_strided_slice %135 {offsets = [0, 256], sizes = [8, 128], strides = [1, 1]} : vector<8x512xf32> to vector<8x128xf32>
    %153 = math.tanh %152 : vector<8x128xf32>
    %154 = vector.extract_strided_slice %135 {offsets = [0, 384], sizes = [8, 128], strides = [1, 1]} : vector<8x512xf32> to vector<8x128xf32>
    %cst_62 = arith.constant 5.000000e-01 : f32
    %155 = vector.broadcast %cst_62 : f32 to vector<8x128xf32>
    %156 = arith.mulf %155, %154 : vector<8x128xf32>
    %157 = math.tanh %156 : vector<8x128xf32>
    %cst_63 = arith.constant 1.000000e+00 : f32
    %158 = vector.broadcast %cst_63 : f32 to vector<8x128xf32>
    %159 = arith.addf %157, %158 : vector<8x128xf32>
    %cst_64 = arith.constant 5.000000e-01 : f32
    %160 = vector.broadcast %cst_64 : f32 to vector<8x128xf32>
    %161 = arith.mulf %160, %159 : vector<8x128xf32>
    %162 = arith.mulf %151, %125 : vector<8x128xf32>
    %163 = arith.mulf %143, %153 : vector<8x128xf32>
    %164 = arith.addf %162, %163 : vector<8x128xf32>
    %165 = math.tanh %164 : vector<8x128xf32>
    %166 = arith.mulf %161, %165 : vector<8x128xf32>
    %167 = arith.index_cast %131 : i32 to index
    %c0_65 = arith.constant 0 : index
    %168 = vector.load %arg5[%167, %c0_65] : memref<64x128xf32, #tpu.memory_space<vmem>>, vector<8x128xf32>
    tpu.vector_store %arg5[%167, %c0_65], %166 {strides = array<i32>} : memref<64x128xf32, #tpu.memory_space<vmem>>, vector<8x128xf32>,
    %c4_i32 = arith.constant 4 : i32
    %c8_i32_66 = arith.constant 8 : i32
    %169 = arith.muli %c4_i32, %c8_i32_66 : i32
    %170 = tpu.assume_multiple %169, 8 : i32
    %171 = arith.index_cast %170 : i32 to index
    %c0_67 = arith.constant 0 : index
    %172 = vector.load %arg8[%171, %c0_67] : memref<64x512xf32, #tpu.memory_space<vmem>>, vector<8x512xf32>
    %cst_68 = arith.constant dense<0.000000e+00> : vector<8x512xf32>
    %173 = tpu.matmul %166, %10, %cst_68 {dimension_numbers = #tpu.dot_dimension_numbers<[1], [0], [0], [1], [0, 0, 1, 1], [], []>} : vector<8x128xf32>, vector<128x512xf32>, vector<8x512xf32> -> vector<8x512xf32>
    %174 = arith.addf %172, %173 : vector<8x512xf32>
    %175 = vector.extract_strided_slice %174 {offsets = [0, 0], sizes = [8, 128], strides = [1, 1]} : vector<8x512xf32> to vector<8x128xf32>
    %cst_69 = arith.constant 5.000000e-01 : f32
    %176 = vector.broadcast %cst_69 : f32 to vector<8x128xf32>
    %177 = arith.mulf %176, %175 : vector<8x128xf32>
    %178 = math.tanh %177 : vector<8x128xf32>
    %cst_70 = arith.constant 1.000000e+00 : f32
    %179 = vector.broadcast %cst_70 : f32 to vector<8x128xf32>
    %180 = arith.addf %178, %179 : vector<8x128xf32>
    %cst_71 = arith.constant 5.000000e-01 : f32
    %181 = vector.broadcast %cst_71 : f32 to vector<8x128xf32>
    %182 = arith.mulf %181, %180 : vector<8x128xf32>
    %183 = vector.extract_strided_slice %174 {offsets = [0, 128], sizes = [8, 128], strides = [1, 1]} : vector<8x512xf32> to vector<8x128xf32>
    %cst_72 = arith.constant 5.000000e-01 : f32
    %184 = vector.broadcast %cst_72 : f32 to vector<8x128xf32>
    %185 = arith.mulf %184, %183 : vector<8x128xf32>
    %186 = math.tanh %185 : vector<8x128xf32>
    %cst_73 = arith.constant 1.000000e+00 : f32
    %187 = vector.broadcast %cst_73 : f32 to vector<8x128xf32>
    %188 = arith.addf %186, %187 : vector<8x128xf32>
    %cst_74 = arith.constant 5.000000e-01 : f32
    %189 = vector.broadcast %cst_74 : f32 to vector<8x128xf32>
    %190 = arith.mulf %189, %188 : vector<8x128xf32>
    %191 = vector.extract_strided_slice %174 {offsets = [0, 256], sizes = [8, 128], strides = [1, 1]} : vector<8x512xf32> to vector<8x128xf32>
    %192 = math.tanh %191 : vector<8x128xf32>
    %193 = vector.extract_strided_slice %174 {offsets = [0, 384], sizes = [8, 128], strides = [1, 1]} : vector<8x512xf32> to vector<8x128xf32>
    %cst_75 = arith.constant 5.000000e-01 : f32
    %194 = vector.broadcast %cst_75 : f32 to vector<8x128xf32>
    %195 = arith.mulf %194, %193 : vector<8x128xf32>
    %196 = math.tanh %195 : vector<8x128xf32>
    %cst_76 = arith.constant 1.000000e+00 : f32
    %197 = vector.broadcast %cst_76 : f32 to vector<8x128xf32>
    %198 = arith.addf %196, %197 : vector<8x128xf32>
    %cst_77 = arith.constant 5.000000e-01 : f32
    %199 = vector.broadcast %cst_77 : f32 to vector<8x128xf32>
    %200 = arith.mulf %199, %198 : vector<8x128xf32>
    %201 = arith.mulf %190, %164 : vector<8x128xf32>
    %202 = arith.mulf %182, %192 : vector<8x128xf32>
    %203 = arith.addf %201, %202 : vector<8x128xf32>
    %204 = math.tanh %203 : vector<8x128xf32>
    %205 = arith.mulf %200, %204 : vector<8x128xf32>
    %206 = arith.index_cast %170 : i32 to index
    %c0_78 = arith.constant 0 : index
    %207 = vector.load %arg5[%206, %c0_78] : memref<64x128xf32, #tpu.memory_space<vmem>>, vector<8x128xf32>
    tpu.vector_store %arg5[%206, %c0_78], %205 {strides = array<i32>} : memref<64x128xf32, #tpu.memory_space<vmem>>, vector<8x128xf32>,
    %c5_i32 = arith.constant 5 : i32
    %c8_i32_79 = arith.constant 8 : i32
    %208 = arith.muli %c5_i32, %c8_i32_79 : i32
    %209 = tpu.assume_multiple %208, 8 : i32
    %210 = arith.index_cast %209 : i32 to index
    %c0_80 = arith.constant 0 : index
    %211 = vector.load %arg8[%210, %c0_80] : memref<64x512xf32, #tpu.memory_space<vmem>>, vector<8x512xf32>
    %cst_81 = arith.constant dense<0.000000e+00> : vector<8x512xf32>
    %212 = tpu.matmul %205, %10, %cst_81 {dimension_numbers = #tpu.dot_dimension_numbers<[1], [0], [0], [1], [0, 0, 1, 1], [], []>} : vector<8x128xf32>, vector<128x512xf32>, vector<8x512xf32> -> vector<8x512xf32>
    %213 = arith.addf %211, %212 : vector<8x512xf32>
    %214 = vector.extract_strided_slice %213 {offsets = [0, 0], sizes = [8, 128], strides = [1, 1]} : vector<8x512xf32> to vector<8x128xf32>
    %cst_82 = arith.constant 5.000000e-01 : f32
    %215 = vector.broadcast %cst_82 : f32 to vector<8x128xf32>
    %216 = arith.mulf %215, %214 : vector<8x128xf32>
    %217 = math.tanh %216 : vector<8x128xf32>
    %cst_83 = arith.constant 1.000000e+00 : f32
    %218 = vector.broadcast %cst_83 : f32 to vector<8x128xf32>
    %219 = arith.addf %217, %218 : vector<8x128xf32>
    %cst_84 = arith.constant 5.000000e-01 : f32
    %220 = vector.broadcast %cst_84 : f32 to vector<8x128xf32>
    %221 = arith.mulf %220, %219 : vector<8x128xf32>
    %222 = vector.extract_strided_slice %213 {offsets = [0, 128], sizes = [8, 128], strides = [1, 1]} : vector<8x512xf32> to vector<8x128xf32>
    %cst_85 = arith.constant 5.000000e-01 : f32
    %223 = vector.broadcast %cst_85 : f32 to vector<8x128xf32>
    %224 = arith.mulf %223, %222 : vector<8x128xf32>
    %225 = math.tanh %224 : vector<8x128xf32>
    %cst_86 = arith.constant 1.000000e+00 : f32
    %226 = vector.broadcast %cst_86 : f32 to vector<8x128xf32>
    %227 = arith.addf %225, %226 : vector<8x128xf32>
    %cst_87 = arith.constant 5.000000e-01 : f32
    %228 = vector.broadcast %cst_87 : f32 to vector<8x128xf32>
    %229 = arith.mulf %228, %227 : vector<8x128xf32>
    %230 = vector.extract_strided_slice %213 {offsets = [0, 256], sizes = [8, 128], strides = [1, 1]} : vector<8x512xf32> to vector<8x128xf32>
    %231 = math.tanh %230 : vector<8x128xf32>
    %232 = vector.extract_strided_slice %213 {offsets = [0, 384], sizes = [8, 128], strides = [1, 1]} : vector<8x512xf32> to vector<8x128xf32>
    %cst_88 = arith.constant 5.000000e-01 : f32
    %233 = vector.broadcast %cst_88 : f32 to vector<8x128xf32>
    %234 = arith.mulf %233, %232 : vector<8x128xf32>
    %235 = math.tanh %234 : vector<8x128xf32>
    %cst_89 = arith.constant 1.000000e+00 : f32
    %236 = vector.broadcast %cst_89 : f32 to vector<8x128xf32>
    %237 = arith.addf %235, %236 : vector<8x128xf32>
    %cst_90 = arith.constant 5.000000e-01 : f32
    %238 = vector.broadcast %cst_90 : f32 to vector<8x128xf32>
    %239 = arith.mulf %238, %237 : vector<8x128xf32>
    %240 = arith.mulf %229, %203 : vector<8x128xf32>
    %241 = arith.mulf %221, %231 : vector<8x128xf32>
    %242 = arith.addf %240, %241 : vector<8x128xf32>
    %243 = math.tanh %242 : vector<8x128xf32>
    %244 = arith.mulf %239, %243 : vector<8x128xf32>
    %245 = arith.index_cast %209 : i32 to index
    %c0_91 = arith.constant 0 : index
    %246 = vector.load %arg5[%245, %c0_91] : memref<64x128xf32, #tpu.memory_space<vmem>>, vector<8x128xf32>
    tpu.vector_store %arg5[%245, %c0_91], %244 {strides = array<i32>} : memref<64x128xf32, #tpu.memory_space<vmem>>, vector<8x128xf32>,
    %c6_i32 = arith.constant 6 : i32
    %c8_i32_92 = arith.constant 8 : i32
    %247 = arith.muli %c6_i32, %c8_i32_92 : i32
    %248 = tpu.assume_multiple %247, 8 : i32
    %249 = arith.index_cast %248 : i32 to index
    %c0_93 = arith.constant 0 : index
    %250 = vector.load %arg8[%249, %c0_93] : memref<64x512xf32, #tpu.memory_space<vmem>>, vector<8x512xf32>
    %cst_94 = arith.constant dense<0.000000e+00> : vector<8x512xf32>
    %251 = tpu.matmul %244, %10, %cst_94 {dimension_numbers = #tpu.dot_dimension_numbers<[1], [0], [0], [1], [0, 0, 1, 1], [], []>} : vector<8x128xf32>, vector<128x512xf32>, vector<8x512xf32> -> vector<8x512xf32>
    %252 = arith.addf %250, %251 : vector<8x512xf32>
    %253 = vector.extract_strided_slice %252 {offsets = [0, 0], sizes = [8, 128], strides = [1, 1]} : vector<8x512xf32> to vector<8x128xf32>
    %cst_95 = arith.constant 5.000000e-01 : f32
    %254 = vector.broadcast %cst_95 : f32 to vector<8x128xf32>
    %255 = arith.mulf %254, %253 : vector<8x128xf32>
    %256 = math.tanh %255 : vector<8x128xf32>
    %cst_96 = arith.constant 1.000000e+00 : f32
    %257 = vector.broadcast %cst_96 : f32 to vector<8x128xf32>
    %258 = arith.addf %256, %257 : vector<8x128xf32>
    %cst_97 = arith.constant 5.000000e-01 : f32
    %259 = vector.broadcast %cst_97 : f32 to vector<8x128xf32>
    %260 = arith.mulf %259, %258 : vector<8x128xf32>
    %261 = vector.extract_strided_slice %252 {offsets = [0, 128], sizes = [8, 128], strides = [1, 1]} : vector<8x512xf32> to vector<8x128xf32>
    %cst_98 = arith.constant 5.000000e-01 : f32
    %262 = vector.broadcast %cst_98 : f32 to vector<8x128xf32>
    %263 = arith.mulf %262, %261 : vector<8x128xf32>
    %264 = math.tanh %263 : vector<8x128xf32>
    %cst_99 = arith.constant 1.000000e+00 : f32
    %265 = vector.broadcast %cst_99 : f32 to vector<8x128xf32>
    %266 = arith.addf %264, %265 : vector<8x128xf32>
    %cst_100 = arith.constant 5.000000e-01 : f32
    %267 = vector.broadcast %cst_100 : f32 to vector<8x128xf32>
    %268 = arith.mulf %267, %266 : vector<8x128xf32>
    %269 = vector.extract_strided_slice %252 {offsets = [0, 256], sizes = [8, 128], strides = [1, 1]} : vector<8x512xf32> to vector<8x128xf32>
    %270 = math.tanh %269 : vector<8x128xf32>
    %271 = vector.extract_strided_slice %252 {offsets = [0, 384], sizes = [8, 128], strides = [1, 1]} : vector<8x512xf32> to vector<8x128xf32>
    %cst_101 = arith.constant 5.000000e-01 : f32
    %272 = vector.broadcast %cst_101 : f32 to vector<8x128xf32>
    %273 = arith.mulf %272, %271 : vector<8x128xf32>
    %274 = math.tanh %273 : vector<8x128xf32>
    %cst_102 = arith.constant 1.000000e+00 : f32
    %275 = vector.broadcast %cst_102 : f32 to vector<8x128xf32>
    %276 = arith.addf %274, %275 : vector<8x128xf32>
    %cst_103 = arith.constant 5.000000e-01 : f32
    %277 = vector.broadcast %cst_103 : f32 to vector<8x128xf32>
    %278 = arith.mulf %277, %276 : vector<8x128xf32>
    %279 = arith.mulf %268, %242 : vector<8x128xf32>
    %280 = arith.mulf %260, %270 : vector<8x128xf32>
    %281 = arith.addf %279, %280 : vector<8x128xf32>
    %282 = math.tanh %281 : vector<8x128xf32>
    %283 = arith.mulf %278, %282 : vector<8x128xf32>
    %284 = arith.index_cast %248 : i32 to index
    %c0_104 = arith.constant 0 : index
    %285 = vector.load %arg5[%284, %c0_104] : memref<64x128xf32, #tpu.memory_space<vmem>>, vector<8x128xf32>
    tpu.vector_store %arg5[%284, %c0_104], %283 {strides = array<i32>} : memref<64x128xf32, #tpu.memory_space<vmem>>, vector<8x128xf32>,
    %c7_i32 = arith.constant 7 : i32
    %c8_i32_105 = arith.constant 8 : i32
    %286 = arith.muli %c7_i32, %c8_i32_105 : i32
    %287 = tpu.assume_multiple %286, 8 : i32
    %288 = arith.index_cast %287 : i32 to index
    %c0_106 = arith.constant 0 : index
    %289 = vector.load %arg8[%288, %c0_106] : memref<64x512xf32, #tpu.memory_space<vmem>>, vector<8x512xf32>
    %cst_107 = arith.constant dense<0.000000e+00> : vector<8x512xf32>
    %290 = tpu.matmul %283, %10, %cst_107 {dimension_numbers = #tpu.dot_dimension_numbers<[1], [0], [0], [1], [0, 0, 1, 1], [], []>} : vector<8x128xf32>, vector<128x512xf32>, vector<8x512xf32> -> vector<8x512xf32>
    %291 = arith.addf %289, %290 : vector<8x512xf32>
    %292 = vector.extract_strided_slice %291 {offsets = [0, 0], sizes = [8, 128], strides = [1, 1]} : vector<8x512xf32> to vector<8x128xf32>
    %cst_108 = arith.constant 5.000000e-01 : f32
    %293 = vector.broadcast %cst_108 : f32 to vector<8x128xf32>
    %294 = arith.mulf %293, %292 : vector<8x128xf32>
    %295 = math.tanh %294 : vector<8x128xf32>
    %cst_109 = arith.constant 1.000000e+00 : f32
    %296 = vector.broadcast %cst_109 : f32 to vector<8x128xf32>
    %297 = arith.addf %295, %296 : vector<8x128xf32>
    %cst_110 = arith.constant 5.000000e-01 : f32
    %298 = vector.broadcast %cst_110 : f32 to vector<8x128xf32>
    %299 = arith.mulf %298, %297 : vector<8x128xf32>
    %300 = vector.extract_strided_slice %291 {offsets = [0, 128], sizes = [8, 128], strides = [1, 1]} : vector<8x512xf32> to vector<8x128xf32>
    %cst_111 = arith.constant 5.000000e-01 : f32
    %301 = vector.broadcast %cst_111 : f32 to vector<8x128xf32>
    %302 = arith.mulf %301, %300 : vector<8x128xf32>
    %303 = math.tanh %302 : vector<8x128xf32>
    %cst_112 = arith.constant 1.000000e+00 : f32
    %304 = vector.broadcast %cst_112 : f32 to vector<8x128xf32>
    %305 = arith.addf %303, %304 : vector<8x128xf32>
    %cst_113 = arith.constant 5.000000e-01 : f32
    %306 = vector.broadcast %cst_113 : f32 to vector<8x128xf32>
    %307 = arith.mulf %306, %305 : vector<8x128xf32>
    %308 = vector.extract_strided_slice %291 {offsets = [0, 256], sizes = [8, 128], strides = [1, 1]} : vector<8x512xf32> to vector<8x128xf32>
    %309 = math.tanh %308 : vector<8x128xf32>
    %310 = vector.extract_strided_slice %291 {offsets = [0, 384], sizes = [8, 128], strides = [1, 1]} : vector<8x512xf32> to vector<8x128xf32>
    %cst_114 = arith.constant 5.000000e-01 : f32
    %311 = vector.broadcast %cst_114 : f32 to vector<8x128xf32>
    %312 = arith.mulf %311, %310 : vector<8x128xf32>
    %313 = math.tanh %312 : vector<8x128xf32>
    %cst_115 = arith.constant 1.000000e+00 : f32
    %314 = vector.broadcast %cst_115 : f32 to vector<8x128xf32>
    %315 = arith.addf %313, %314 : vector<8x128xf32>
    %cst_116 = arith.constant 5.000000e-01 : f32
    %316 = vector.broadcast %cst_116 : f32 to vector<8x128xf32>
    %317 = arith.mulf %316, %315 : vector<8x128xf32>
    %318 = arith.mulf %307, %281 : vector<8x128xf32>
    %319 = arith.mulf %299, %309 : vector<8x128xf32>
    %320 = arith.addf %318, %319 : vector<8x128xf32>
    %321 = math.tanh %320 : vector<8x128xf32>
    %322 = arith.mulf %317, %321 : vector<8x128xf32>
    %323 = arith.index_cast %287 : i32 to index
    %c0_117 = arith.constant 0 : index
    %324 = vector.load %arg5[%323, %c0_117] : memref<64x128xf32, #tpu.memory_space<vmem>>, vector<8x128xf32>
    tpu.vector_store %arg5[%323, %c0_117], %322 {strides = array<i32>} : memref<64x128xf32, #tpu.memory_space<vmem>>, vector<8x128xf32>,
    %c8_i32_118 = arith.constant 8 : i32
    %c0_119 = arith.constant 0 : index
    %c0_120 = arith.constant 0 : index
    %325 = vector.load %arg6[%c0_119, %c0_120] : memref<8x128xf32, #tpu.memory_space<vmem>>, vector<8x128xf32>
    tpu.vector_store %arg6[%c0_119, %c0_120], %322 {strides = array<i32>} : memref<8x128xf32, #tpu.memory_space<vmem>>, vector<8x128xf32>,
    %c0_121 = arith.constant 0 : index
    %c0_122 = arith.constant 0 : index
    %326 = vector.load %arg7[%c0_121, %c0_122] : memref<8x128xf32, #tpu.memory_space<vmem>>, vector<8x128xf32>
    tpu.vector_store %arg7[%c0_121, %c0_122], %320 {strides = array<i32>} : memref<8x128xf32, #tpu.memory_space<vmem>>, vector<8x128xf32>,
    return
  }
  func.func @transform_0(%arg0: i32) -> (i32, i32) {
    %c0_i32 = arith.constant 0 : i32
    %c0_i32_0 = arith.constant 0 : i32
    return %arg0, %c0_i32 : i32, i32
  }
  func.func @transform_1(%arg0: i32) -> (i32, i32) {
    %c0_i32 = arith.constant 0 : i32
    %c0_i32_0 = arith.constant 0 : i32
    %c0_i32_1 = arith.constant 0 : i32
    return %c0_i32, %c0_i32_0 : i32, i32
  }
  func.func @transform_2(%arg0: i32) -> (i32, i32) {
    %c0_i32 = arith.constant 0 : i32
    %c0_i32_0 = arith.constant 0 : i32
    %c0_i32_1 = arith.constant 0 : i32
    return %c0_i32, %c0_i32_0 : i32, i32
  }
  func.func @transform_3(%arg0: i32) -> (i32, i32) {
    %c0_i32 = arith.constant 0 : i32
    %c0_i32_0 = arith.constant 0 : i32
    %c0_i32_1 = arith.constant 0 : i32
    return %c0_i32, %c0_i32_0 : i32, i32
  }
  func.func @transform_4(%arg0: i32) -> (i32, i32) {
    %c0_i32 = arith.constant 0 : i32
    %c0_i32_0 = arith.constant 0 : i32
    return %arg0, %c0_i32 : i32, i32
  }
  func.func @transform_5(%arg0: i32) -> (i32, i32) {
    %c0_i32 = arith.constant 0 : i32
    %c0_i32_0 = arith.constant 0 : i32
    %c0_i32_1 = arith.constant 0 : i32
    return %c0_i32, %c0_i32_0 : i32, i32
  }
  func.func @transform_6(%arg0: i32) -> (i32, i32) {
    %c0_i32 = arith.constant 0 : i32
    %c0_i32_0 = arith.constant 0 : i32
    %c0_i32_1 = arith.constant 0 : i32
    return %c0_i32, %c0_i32_0 : i32, i32
  }
}

</mosaic_0001>

<bundles_post_ra>
// kernel: tpu_custom_call.1
= control target key start
LH: loop header
LB: loop body
LE: loop exit
PB: predicated region body
PF: predicated region fallthrough
CT: control target
= control target key end

     0   :  { %12 = vsyncpa [#allocation4], 0  ;;  %s3284_s0 = inlined_call_operand.vmem [shape: f32[64,32], index: 0, kind: input, shape index: {}]   ;;  %s3285_s1 = inlined_call_operand.hbm [shape: f32[32,512], index: 1, kind: input, shape index: {}]   ;;  %s3286_s2 = inlined_call_operand.hbm [shape: f32[128,512], index: 2, kind: input, shape index: {}]   ;;  %s3287_s3 = inlined_call_operand.vmem [shape: f32[1,512], index: 3, kind: input, shape index: {}]   ;;  %s3288_s4 = inlined_call_operand.hbm [shape: f32[64,128], index: 4, kind: output, shape index: {0}]   ;;  %s3289_s5 = inlined_call_operand.hbm [shape: f32[8,128], index: 5, kind: output, shape index: {1}]   ;;  %s3290_s6 = inlined_call_operand.hbm [shape: f32[8,128], index: 6, kind: output, shape index: {2}]  }
   0x1   :  { %13 = vsyncpa [#allocation7], 0 }
   0x2   :  { %14 = vsyncpa [#allocation5], 0 }
   0x3   :  { %15 = vsyncpa [#allocation10], 0  ;;  %s2704_s21 = smov [#allocation3]   ;;  %s2586_s25 = scalar_lea.hbm %s3285_s1, 2048 }
   0x4   :  { %s23_s22 = sshll.u32 %s2704_s21, 4  ;;  %p2587_p0 = scmp.ne.s32.totalorder %s3285_s1, %s2586_s25  ;;  %s24_s22 = int_to_ptr.vmem [resolvable:$true] %s23_s22 }
   0x5   :  { %p2590_p1 = scmp.lt.u32.totalorder %s2586_s25, %s3285_s1 }
   0x7   :  { %p2592_p2 = pnand %p2590_p1, %p2587_p0 }
   0x9   :  { %2595 = shalt.err (!%p2592_p2)
}
   0xa   :  { %s2596_s30 = scalar_lea.vmem %s24_s22, 2048  ;;  %p2601_p4 = scmp.lt.s32.totalorder %s24_s22, %s24_s22 }
   0xb   :  { %p2597_p3 = scmp.ne.s32.totalorder %s24_s22, %s2596_s30  ;;  %p2602_p5 = scmp.lt.s32.totalorder %s2596_s30, %s2596_s30 }
   0xd   :  { %p2603_p6 = por %p2602_p5, %p2601_p4 }
   0xf   :  { %p2604_p7 = pnand %p2603_p6, %p2597_p3 }
  0x11   :  { %2607 = shalt.err (!%p2604_p7)
}
  0x12   :  { %s2705_s7 = smov 512   ;;  %s2706_s8 = smov 32  }
  0x13   :  { %29 = dma.hbm_to_vmem [thread:$0]  %s3285_s1, 2048, %s24_s22, [#allocation4], %s2705_s7, %s2705_s7, %s2706_s8  }
  0x14   :  { %s2707_s11 = smov [#allocation6]   ;;  %s2608_s15 = scalar_lea.hbm %s3286_s2, 8192 }
  0x15   :  { %s35_s12 = sshll.u32 %s2707_s11, 4  ;;  %p2609_p8 = scmp.ne.s32.totalorder %s3286_s2, %s2608_s15  ;;  %s36_s12 = int_to_ptr.vmem [resolvable:$true] %s35_s12 }
  0x16   :  { %p2612_p9 = scmp.lt.u32.totalorder %s2608_s15, %s3286_s2 }
  0x18   :  { %p2614_p10 = pnand %p2612_p9, %p2609_p8 }
  0x1a   :  { %2617 = shalt.err (!%p2614_p10)
}
  0x1b   :  { %s2618_s20 = scalar_lea.vmem %s36_s12, 8192  ;;  %p2623_p12 = scmp.lt.s32.totalorder %s36_s12, %s36_s12 }
  0x1c   :  { %p2619_p11 = scmp.ne.s32.totalorder %s36_s12, %s2618_s20  ;;  %p2624_p13 = scmp.lt.s32.totalorder %s2618_s20, %s2618_s20 }
  0x1e   :  { %p2625_p0 = por %p2624_p13, %p2623_p12 }
  0x20   :  { %p2626_p1 = pnand %p2625_p0, %p2619_p11 }
  0x22   :  { %2629 = shalt.err (!%p2626_p1)
}
  0x23   :  { %41 = dma.hbm_to_vmem [thread:$0]  %s3286_s2, 8192, %s36_s12, [#allocation7], %s2705_s7, %s2705_s7, %s2706_s8  }
  0x24   :  { %2696 = dma.done.wait [#allocation4], 2048  }
  0x25   :  { %2697 = vsyncadd [#allocation4], 4294965248 }
  0x26   :  { %2698 = dma.done.wait [#allocation7], 8192  }
  0x27   :  { %2699 = vsyncadd [#allocation7], 4294959104  ;;  %v2708_v0 = vmov 0.0   ;;  %v65_v1 = vld [vmem:[#allocation3 + $0x8] sm:$0xff]  ;;  %v67_v3 = vld [vmem:[#allocation3 + $0x18] sm:$0xff]  ;;  %vm102_vm0 = vcmask 261120  }
  0x28   :  { %191 = vmatprep.mubr.f32.mxu0 %v2708_v0  ;;  %304 = vmatprep.mubr.f32.mxu1 %v2708_v0  ;;  %v69_v2 = vld [vmem:[#allocation3 + $0x28] sm:$0xff]  ;;  %v71_v5 = vld [vmem:[#allocation3 + $0x38] sm:$0xff]  ;;  %v64_v6 = vld [vmem:[#allocation3] sm:$0xff]  ;;  %s2710_s15 = smov [#allocation8]   ;;  %s2711_s17 = smov [#allocation11]  }
  0x29   :  { %v1904_v4 = vpack.c.bf16 %v69_v2, %v65_v1  ;;  %v68_v7 = vld [vmem:[#allocation3 + $0x20] sm:$0xff]  ;;  %v1912_v8 = vpack.c.bf16 %v71_v5, %v67_v3  ;;  %v66_v10 = vld [vmem:[#allocation3 + $0x10] sm:$0xff]  ;;  %v73_v12 = vld [vmem:[#allocation3 + $0x48] sm:$0xff]  ;;  %s1841_s16 = sshll.u32 %s2710_s15, 4  ;;  %s1864_s18 = sshll.u32 %s2711_s17, 4  ;;  %s3234_s16 = int_to_ptr.vmem [resolvable:$true] %s1841_s16  ;;  %s3236_s18 = int_to_ptr.vmem [resolvable:$true] %s1864_s18 }
  0x2a   :  { %v1906_v9 = vpack.c.bf16 %v68_v7, %v64_v6  ;;  %v70_v11 = vld [vmem:[#allocation3 + $0x30] sm:$0xff]  ;;  %v77_v14 = vld [vmem:[#allocation3 + $0x68] sm:$0xff]  ;;  %v75_v15 = vld [vmem:[#allocation3 + $0x58] sm:$0xff] }
  0x2b   :  { %1905 = vmatprep.subr.bf16.mxu0 %v1904_v4  ;;  %v1914_v13 = vpack.c.bf16 %v70_v11, %v66_v10  ;;  %v79_v16 = vld [vmem:[#allocation3 + $0x78] sm:$0xff]  ;;  %1913 = vmatprep.subr.bf16.mxu1 %v1912_v8  ;;  %v1908_v17 = vpack.c.bf16 %v77_v14, %v73_v12  ;;  %v72_v19 = vld [vmem:[#allocation3 + $0x40] sm:$0xff]  ;;  %v74_v21 = vld [vmem:[#allocation3 + $0x50] sm:$0xff] }
  0x2c   :  { %1907 = vmatpush1.bf16.msra.mxu0 %v1906_v9  ;;  %v1916_v18 = vpack.c.bf16 %v79_v16, %v75_v15  ;;  %v76_v20 = vld [vmem:[#allocation3 + $0x60] sm:$0xff]  ;;  %v78_v23 = vld [vmem:[#allocation3 + $0x70] sm:$0xff]  ;;  %v386_v24 = vld [vmem:[#allocation6 + $0x8] sm:$0xff] }
  0x2d   :  { %1915 = vmatpush1.bf16.msra.mxu1 %v1914_v13  ;;  %v1910_v22 = vpack.c.bf16 %v76_v20, %v72_v19  ;;  %1909 = vmatprep.subr.bf16.mxu0 %v1908_v17  ;;  %v1918_v25 = vpack.c.bf16 %v78_v23, %v74_v21  ;;  %v390_v26 = vld [vmem:[#allocation6 + $0x28] sm:$0xff]  ;;  %v388_v27 = vld [vmem:[#allocation6 + $0x18] sm:$0xff]  ;;  %v385_v31 = vld [vmem:[#allocation6] sm:$0xff] }
  0x2e   :  { %1917 = vmatprep.subr.bf16.mxu1 %v1916_v18  ;;  %v392_v28 = vld [vmem:[#allocation6 + $0x38] sm:$0xff]  ;;  %v2775_v29 = vpack.c.bf16 %v390_v26, %v386_v24  ;;  %v389_v32 = vld [vmem:[#allocation6 + $0x20] sm:$0xff]  ;;  %v387_v33 = vld [vmem:[#allocation6 + $0x10] sm:$0xff] }
  0x2f   :  { %v2777_v30 = vpack.c.bf16 %v392_v28, %v388_v27  ;;  %v56_v34 = vld [vmem:[%s3284_s0] sm:$0xff]  ;;  %v2782_v35 = vpack.c.bf16 %v389_v32, %v385_v31  ;;  %v391_v36 = vld [vmem:[#allocation6 + $0x30] sm:$0xff]  ;;  %v394_v37 = vld [vmem:[#allocation6 + $0x48] sm:$0xff] }
  0x30   :  { %1911 = vmatpush1.bf16.msra.mxu0 %v1910_v22  ;;  %v2785_v38 = vpack.c.bf16 %v391_v36, %v387_v33  ;;  %v398_v39 = vld [vmem:[#allocation6 + $0x68] sm:$0xff]  ;;  %v396_v40 = vld [vmem:[#allocation6 + $0x58] sm:$0xff]  ;;  %v393_v43 = vld [vmem:[#allocation6 + $0x40] sm:$0xff] }
  0x31   :  { %1919 = vmatpush1.bf16.msra.mxu1 %v1918_v25  ;;  %1921 = vmatprep.subr.bf16.mxu0 %v2775_v29  ;;  %v400_v41 = vld [vmem:[#allocation6 + $0x78] sm:$0xff]  ;;  %v2788_v42 = vpack.c.bf16 %v398_v39, %v394_v37  ;;  %v397_v44 = vld [vmem:[#allocation6 + $0x60] sm:$0xff]  ;;  %v395_v45 = vld [vmem:[#allocation6 + $0x50] sm:$0xff] }
  0x32   :  { %1953 = vmatprep.subr.bf16.mxu1 %v2777_v30  ;;  %v57_v46 = vld [vmem:[%s3284_s0 + $0x8] sm:$0xff]  ;;  %v2794_v47 = vpack.c.bf16 %v400_v41, %v396_v40  ;;  %v399_v48 = vld [vmem:[#allocation6 + $0x70] sm:$0xff]  ;;  %v2798_v50 = vpack.c.bf16 %v397_v44, %v393_v43  ;;  %v404_v52 = vld [vmem:[#allocation6 + $0x98] sm:$0xff] }
  0x33   :  { %1888 = vmatmul.mubr.msk.f32.vlgmr.msra.gmra.mrb[0].mxu0 %vm102_vm0, %v56_v34  ;;  %v402_v49 = vld [vmem:[#allocation6 + $0x88] sm:$0xff]  ;;  %v408_v53 = vld [vmem:[#allocation6 + $0xb8] sm:$0xff]  ;;  %v2802_v54 = vpack.c.bf16 %v399_v48, %v395_v45  ;;  %v401_v55 = vld [vmem:[#allocation6 + $0x80] sm:$0xff] }
  0x34   :  { %1896 = vmatmul.mubr.msk.f32.vlgmr.msra.gmra.mrb[0].mxu1 %vm102_vm0, %v56_v34  ;;  %1923 = vmatpush1.bf16.msra.mxu0 %v2782_v35  ;;  %v406_v51 = vld [vmem:[#allocation6 + $0xa8] sm:$0xff]  ;;  %v405_v56 = vld [vmem:[#allocation6 + $0xa0] sm:$0xff]  ;;  %v403_v58 = vld [vmem:[#allocation6 + $0x90] sm:$0xff]  ;;  %v2810_v60 = vpack.c.bf16 %v408_v53, %v404_v52 }
  0x35   :  { %1955 = vmatpush1.bf16.msra.mxu1 %v2785_v38  ;;  %197 = vmatprep.mubr.f32.mxu0 %v2708_v0  ;;  %v2806_v57 = vpack.c.bf16 %v406_v51, %v402_v49  ;;  %v407_v59 = vld [vmem:[#allocation6 + $0xb0] sm:$0xff]  ;;  %v410_v61 = vld [vmem:[#allocation6 + $0xc8] sm:$0xff]  ;;  %v2817_v1 = vpack.c.bf16 %v405_v56, %v401_v55  ;;  %v412_v2 = vld [vmem:[#allocation6 + $0xd8] sm:$0xff] }
  0x36   :  { %310 = vmatprep.mubr.f32.mxu1 %v2708_v0  ;;  %1925 = vmatprep.subr.bf16.mxu0 %v2788_v42  ;;  %v414_v62 = vld [vmem:[#allocation6 + $0xe8] sm:$0xff]  ;;  %v58_v63 = vld [vmem:[%s3284_s0 + $0x10] sm:$0xff]  ;;  %v416_v3 = vld [vmem:[#allocation6 + $0xf8] sm:$0xff]  ;;  %v2821_v4 = vpack.c.bf16 %v407_v59, %v403_v58 }
  0x37   :  { %1889 = vmatmul.mubr.msk.f32.gmra.mrb[2].mxu0 %vm102_vm0, %v57_v46  ;;  %1957 = vmatprep.subr.bf16.mxu1 %v2794_v47  ;;  %v409_v5 = vld [vmem:[#allocation6 + $0xc0] sm:$0xff]  ;;  %v2825_v7 = vpack.c.bf16 %v414_v62, %v410_v61  ;;  %v411_v8 = vld [vmem:[#allocation6 + $0xd0] sm:$0xff]  ;;  %v2829_v10 = vpack.c.bf16 %v416_v3, %v412_v2  ;;  %v418_v11 = vld [vmem:[#allocation6 + $0x108] sm:$0xff] }
  0x38   :  { %1897 = vmatmul.mubr.msk.f32.gmra.mrb[2].mxu1 %vm102_vm0, %v57_v46  ;;  %1927 = vmatpush1.bf16.msra.mxu0 %v2798_v50  ;;  %v413_v6 = vld [vmem:[#allocation6 + $0xe0] sm:$0xff]  ;;  %v415_v9 = vld [vmem:[#allocation6 + $0xf0] sm:$0xff]  ;;  %v422_v12 = vld [vmem:[#allocation6 + $0x128] sm:$0xff] }
  0x39   :  { %1959 = vmatpush1.bf16.msra.mxu1 %v2802_v54  ;;  %203 = vmatprep.mubr.f32.mxu0 %v2708_v0  ;;  %v59_v13 = vld [vmem:[%s3284_s0 + $0x18] sm:$0xff]  ;;  %v2836_v14 = vpack.c.bf16 %v413_v6, %v409_v5  ;;  %v2840_v17 = vpack.c.bf16 %v415_v9, %v411_v8  ;;  %v417_v18 = vld [vmem:[#allocation6 + $0x100] sm:$0xff]  ;;  %v2844_v20 = vpack.c.bf16 %v422_v12, %v418_v11  ;;  %v419_v21 = vld [vmem:[#allocation6 + $0x110] sm:$0xff] }
  0x3a   :  { %316 = vmatprep.mubr.f32.mxu1 %v2708_v0  ;;  %1929 = vmatprep.subr.bf16.mxu0 %v2806_v57  ;;  %v420_v15 = vld [vmem:[#allocation6 + $0x118] sm:$0xff]  ;;  %v421_v19 = vld [vmem:[#allocation6 + $0x120] sm:$0xff]  ;;  %v423_v22 = vld [vmem:[#allocation6 + $0x130] sm:$0xff] }
  0x3b   :  { %1890 = vmatmul.mubr.msk.f32.gmra.mrb[4].mxu0 %vm102_vm0, %v58_v63  ;;  %1961 = vmatprep.subr.bf16.mxu1 %v2810_v60  ;;  %v424_v16 = vld [vmem:[#allocation6 + $0x138] sm:$0xff]  ;;  %v426_v24 = vld [vmem:[#allocation6 + $0x148] sm:$0xff]  ;;  %v60_v26 = vld [vmem:[%s3284_s0 + $0x20] sm:$0xff]  ;;  %v2855_v27 = vpack.c.bf16 %v421_v19, %v417_v18  ;;  %v2859_v32 = vpack.c.bf16 %v423_v22, %v419_v21  ;;  %v82_v19 = vlaneseq }
  0x3c   :  { %1898 = vmatmul.mubr.msk.f32.gmra.mrb[4].mxu1 %vm102_vm0, %v58_v63  ;;  %1931 = vmatpush1.bf16.msra.mxu0 %v2817_v1  ;;  %v2848_v23 = vpack.c.bf16 %v424_v16, %v420_v15  ;;  %v430_v25 = vld [vmem:[#allocation6 + $0x168] sm:$0xff]  ;;  %v428_v28 = vld [vmem:[#allocation6 + $0x158] sm:$0xff]  ;;  %v425_v33 = vld [vmem:[#allocation6 + $0x140] sm:$0xff] }
  0x3d   :  { %1963 = vmatpush1.bf16.msra.mxu1 %v2821_v4  ;;  %209 = vmatprep.mubr.f32.mxu0 %v2708_v0  ;;  %v432_v31 = vld [vmem:[#allocation6 + $0x178] sm:$0xff]  ;;  %v429_v34 = vld [vmem:[#allocation6 + $0x160] sm:$0xff]  ;;  %v2863_v36 = vpack.c.bf16 %v430_v25, %v426_v24  ;;  %v427_v37 = vld [vmem:[#allocation6 + $0x150] sm:$0xff]  ;;  %v83_v21 = vshrl.u32 %v82_v19, 7 }
  0x3e   :  { %322 = vmatprep.mubr.f32.mxu1 %v2708_v0  ;;  %1933 = vmatprep.subr.bf16.mxu0 %v2825_v7  ;;  %v431_v39 = vld [vmem:[#allocation6 + $0x170] sm:$0xff]  ;;  %v2867_v40 = vpack.c.bf16 %v432_v31, %v428_v28  ;;  %v434_v41 = vld [vmem:[#allocation6 + $0x188] sm:$0xff]  ;;  %v2874_v45 = vpack.c.bf16 %v429_v34, %v425_v33  ;;  %v436_v46 = vld [vmem:[#allocation6 + $0x198] sm:$0xff] }
  0x3f   :  { %1891 = vmatmul.mubr.msk.f32.gmra.mrb[6].mxu0 %vm102_vm0, %v59_v13  ;;  %1965 = vmatprep.subr.bf16.mxu1 %v2829_v10  ;;  %v438_v43 = vld [vmem:[#allocation6 + $0x1a8] sm:$0xff]  ;;  %v440_v48 = vld [vmem:[#allocation6 + $0x1b8] sm:$0xff]  ;;  %v2878_v49 = vpack.c.bf16 %v431_v39, %v427_v37  ;;  %v433_v51 = vld [vmem:[#allocation6 + $0x180] sm:$0xff]  ;;  %v84_v22 = vsub.s32 0, %v83_v21  ;;  %v88_v25 = vsub.s32 1, %v83_v21  ;;  %v92_v28 = vsub.s32 2, %v83_v21 }
  0x40   :  { %1899 = vmatmul.mubr.msk.f32.gmra.mrb[6].mxu1 %vm102_vm0, %v59_v13  ;;  %1935 = vmatpush1.bf16.msra.mxu0 %v2836_v14  ;;  %v61_v44 = vld [vmem:[%s3284_s0 + $0x28] sm:$0xff]  ;;  %v437_v52 = vld [vmem:[#allocation6 + $0x1a0] sm:$0xff]  ;;  %v2882_v53 = vpack.c.bf16 %v438_v43, %v434_v41  ;;  %v435_v55 = vld [vmem:[#allocation6 + $0x190] sm:$0xff]  ;;  %v2886_v58 = vpack.c.bf16 %v440_v48, %v436_v46  ;;  %v96_v43 = vsub.s32 3, %v83_v21 }
  0x41   :  { %1967 = vmatpush1.bf16.msra.mxu1 %v2840_v17  ;;  %215 = vmatprep.mubr.f32.mxu0 %v2708_v0  ;;  %v439_v56 = vld [vmem:[#allocation6 + $0x1b0] sm:$0xff]  ;;  %v442_v59 = vld [vmem:[#allocation6 + $0x1c8] sm:$0xff]  ;;  %v2893_v63 = vpack.c.bf16 %v437_v52, %v433_v51  ;;  %v444_v2 = vld [vmem:[#allocation6 + $0x1d8] sm:$0xff] }
  0x42   :  { %328 = vmatprep.mubr.f32.mxu1 %v2708_v0  ;;  %1937 = vmatprep.subr.bf16.mxu0 %v2844_v20  ;;  %v446_v61 = vld [vmem:[#allocation6 + $0x1e8] sm:$0xff]  ;;  %v62_v62 = vld [vmem:[%s3284_s0 + $0x30] sm:$0xff]  ;;  %v448_v3 = vld [vmem:[#allocation6 + $0x1f8] sm:$0xff]  ;;  %v2897_v5 = vpack.c.bf16 %v439_v56, %v435_v55 }
  0x43   :  { %1892 = vmatmul.mubr.msk.f32.gmra.mrb[8].mxu0 %vm102_vm0, %v60_v26  ;;  %1969 = vmatprep.subr.bf16.mxu1 %v2848_v23  ;;  %v441_v6 = vld [vmem:[#allocation6 + $0x1c0] sm:$0xff]  ;;  %v2901_v9 = vpack.c.bf16 %v446_v61, %v442_v59  ;;  %v443_v11 = vld [vmem:[#allocation6 + $0x1d0] sm:$0xff]  ;;  %v2905_v13 = vpack.c.bf16 %v448_v3, %v444_v2  ;;  %v63_v15 = vld [vmem:[%s3284_s0 + $0x38] sm:$0xff] }
  0x44   :  { %1900 = vmatmul.mubr.msk.f32.gmra.mrb[8].mxu1 %vm102_vm0, %v60_v26  ;;  %1939 = vmatpush1.bf16.msra.mxu0 %v2855_v27  ;;  %v445_v8 = vld [vmem:[#allocation6 + $0x1e0] sm:$0xff]  ;;  %v447_v12 = vld [vmem:[#allocation6 + $0x1f0] sm:$0xff] }
  0x45   :  { %1971 = vmatpush1.bf16.msra.mxu1 %v2859_v32  ;;  %221 = vmatprep.mubr.f32.mxu0 %v2708_v0  ;;  %v2912_v16 = vpack.c.bf16 %v445_v8, %v441_v6  ;;  %v2916_v18 = vpack.c.bf16 %v447_v12, %v443_v11  ;;  %v80_v24 = vld [vmem:[%s3287_s3] sm:$0xf]  ;;  %s2709_s3 = smov [#allocation9]  }
  0x46   :  { %334 = vmatprep.mubr.f32.mxu1 %v2708_v0  ;;  %1941 = vmatprep.subr.bf16.mxu0 %v2863_v36  ;;  %v2968_v26 = vrot.slane %v80_v24, %v84_v22  ;;  %v2970_v31 = vrot.slane %v80_v24, %v88_v25  ;;  %v2973_v37 = vrot.slane %v80_v24, %v92_v28  ;;  %s1854_s14 = sshll.u32 %s2709_s3, 4  ;;  %s1855_s14 = int_to_ptr.vmem [resolvable:$true] %s1854_s14 }
  0x47   :  { %1893 = vmatmul.mubr.msk.f32.gmra.mrb[10].mxu0 %vm102_vm0, %v61_v44  ;;  %1973 = vmatprep.subr.bf16.mxu1 %v2867_v40  ;;  %v2977_v55 = vrot.slane %v80_v24, %v96_v43  ;;  %s2630_s19 = scalar_lea.vmem %s1855_s14, 128  ;;  %p2635_p3 = scmp.lt.s32.totalorder %s1855_s14, %s1855_s14 }
  0x48   :  { %1901 = vmatmul.mubr.msk.f32.gmra.mrb[10].mxu1 %vm102_vm0, %v61_v44  ;;  %1943 = vmatpush1.bf16.msra.mxu0 %v2874_v45  ;;  %p2631_p2 = scmp.ne.s32.totalorder %s1855_s14, %s2630_s19  ;;  %p2636_p4 = scmp.lt.s32.totalorder %s2630_s19, %s2630_s19 }
  0x49   :  { %1975 = vmatpush1.bf16.msra.mxu1 %v2878_v49  ;;  %227 = vmatprep.mubr.f32.mxu0 %v2708_v0 }
  0x4a   :  { %340 = vmatprep.mubr.f32.mxu1 %v2708_v0  ;;  %1945 = vmatprep.subr.bf16.mxu0 %v2882_v53  ;;  %p2637_p5 = por %p2636_p4, %p2635_p3 }
  0x4b   :  { %1894 = vmatmul.mubr.msk.f32.gmra.mrb[12].mxu0 %vm102_vm0, %v62_v62  ;;  %1977 = vmatprep.subr.bf16.mxu1 %v2886_v58 }
  0x4c   :  { %1902 = vmatmul.mubr.msk.f32.gmra.mrb[12].mxu1 %vm102_vm0, %v62_v62  ;;  %1947 = vmatpush1.bf16.msra.mxu0 %v2893_v63  ;;  %p2638_p6 = pnand %p2637_p5, %p2631_p2 }
  0x4d   :  { %1979 = vmatpush1.bf16.msra.mxu1 %v2897_v5  ;;  %233 = vmatprep.mubr.f32.mxu0 %v2708_v0 }
  0x4e   :  { %346 = vmatprep.mubr.f32.mxu1 %v2708_v0  ;;  %1949 = vmatprep.subr.bf16.mxu0 %v2901_v9 }
  0x4f   :  { %1895 = vmatmul.mubr.msk.f32.gmra.mrb[14].mxu0 %vm102_vm0, %v63_v15  ;;  %1981 = vmatprep.subr.bf16.mxu1 %v2905_v13 }
  0x50   :  { %1903 = vmatmul.mubr.msk.f32.gmra.mrb[14].mxu1 %vm102_vm0, %v63_v15  ;;  %1951 = vmatpush1.bf16.msra.mxu0 %v2912_v16 }
  0x51   :  { %1983 = vmatpush1.bf16.msra.mxu1 %v2916_v18  ;;  %522 = vmatprep.mubr.f32.mxu0 %v2708_v0 }
  0x52   :  { %593 = vmatprep.mubr.f32.mxu1 %v2708_v0  ;;  %1985 = vmatprep.subr.bf16.mxu0 %v2775_v29 }
  0x53   :  { %523 = vmatmul.mubr.f32.vlgmr.msra.gmra.mrb[0].mxu0 %v2708_v0  ;;  %2017 = vmatprep.subr.bf16.mxu1 %v2777_v30 }
  0x54   :  { %594 = vmatmul.mubr.f32.vlgmr.msra.gmra.mrb[0].mxu1 %v2708_v0  ;;  %1987 = vmatpush1.bf16.msra.mxu0 %v2782_v35 }
  0x55   :  { %2019 = vmatpush1.bf16.msra.mxu1 %v2785_v38  ;;  %1989 = vmatprep.subr.bf16.mxu0 %v2788_v42 }
  0x56   :  { %2021 = vmatprep.subr.bf16.mxu1 %v2794_v47  ;;  %694 = vmatprep.mubr.f32.mxu0 %v2708_v0 }
  0x57   :  { %765 = vmatprep.mubr.f32.mxu1 %v2708_v0 }
  0x58   :  { %1991 = vmatpush1.bf16.msra.mxu0 %v2798_v50 }
  0x59   :  { %2023 = vmatpush1.bf16.msra.mxu1 %v2802_v54  ;;  %1993 = vmatprep.subr.bf16.mxu0 %v2806_v57 }
  0x5a   :  { %2025 = vmatprep.subr.bf16.mxu1 %v2810_v60 }
  0x5c   :  { %1995 = vmatpush1.bf16.msra.mxu0 %v2817_v1 }
  0x5d   :  { %2027 = vmatpush1.bf16.msra.mxu1 %v2821_v4  ;;  %1997 = vmatprep.subr.bf16.mxu0 %v2825_v7 }
  0x5e   :  { %2029 = vmatprep.subr.bf16.mxu1 %v2829_v10 }
  0x60   :  { %1999 = vmatpush1.bf16.msra.mxu0 %v2836_v14 }
  0x61   :  { %2031 = vmatpush1.bf16.msra.mxu1 %v2840_v17  ;;  %2001 = vmatprep.subr.bf16.mxu0 %v2844_v20 }
  0x62   :  { %2033 = vmatprep.subr.bf16.mxu1 %v2848_v23 }
  0x64   :  { %2003 = vmatpush1.bf16.msra.mxu0 %v2855_v27 }
  0x65   :  { %2035 = vmatpush1.bf16.msra.mxu1 %v2859_v32  ;;  %2005 = vmatprep.subr.bf16.mxu0 %v2863_v36 }
  0x66   :  { %2037 = vmatprep.subr.bf16.mxu1 %v2867_v40 }
  0x68   :  { %2007 = vmatpush1.bf16.msra.mxu0 %v2874_v45 }
  0x69   :  { %2039 = vmatpush1.bf16.msra.mxu1 %v2878_v49  ;;  %2009 = vmatprep.subr.bf16.mxu0 %v2882_v53 }
  0x6a   :  { %2041 = vmatprep.subr.bf16.mxu1 %v2886_v58 }
  0x6c   :  { %2011 = vmatpush1.bf16.msra.mxu0 %v2893_v63 }
  0x6d   :  { %2043 = vmatpush1.bf16.msra.mxu1 %v2897_v5  ;;  %2013 = vmatprep.subr.bf16.mxu0 %v2901_v9 }
  0x6e   :  { %2045 = vmatprep.subr.bf16.mxu1 %v2905_v13 }
  0x70   :  { %2015 = vmatpush1.bf16.msra.mxu0 %v2912_v16 }
  0x71   :  { %2047 = vmatpush1.bf16.msra.mxu1 %v2916_v18  ;;  %2049 = vmatprep.subr.bf16.mxu0 %v2775_v29 }
  0x72   :  { %2081 = vmatprep.subr.bf16.mxu1 %v2777_v30 }
 0x126   :  { %v524_v33 = vpop.f32.mrb[0].mxu0 }
 0x127   :  { %v2432_v34 = vadd.f32 %v524_v33, %v2968_v26  ;;  %v595_v39 = vpop.f32.mrb[0].mxu1  ;;  %v526_v41 = vpop.f32.mrb[1].mxu0 }
 0x128   :  { %v2433_v44 = vadd.f32 %v526_v41, %v2970_v31  ;;  %v597_v46 = vpop.f32.mrb[1].mxu1  ;;  %v2448_v52 = vadd.f32 %v595_v39, %v2973_v37 }
 0x129   :  { %v604_v48 = vmul.f32 0.5, %v2432_v34  ;;  %v2449_v56 = vadd.f32 %v597_v46, %v2977_v55 }
 0x12a   :  { %v608_v51 = vmul.f32 0.5, %v2433_v44 }
 0x12b   :  { %2506 = vtanh.f32 %v604_v48  ;;  %v613_v59 = vmul.f32 0.5, %v2449_v56 }
 0x12c   :  { %2508 = vtanh.f32 %v608_v51 }
 0x12d   :  { %2510 = vtanh.f32 %v2448_v52 }
 0x12e   :  { %2512 = vtanh.f32 %v613_v59 }
 0x135   :  { %v2507_v61 = vpop.eup %2506 }
 0x136   :  { %v2509_v62 = vpop.eup %2508  ;;  %v606_v2 = vadd.f32 1.0, %v2507_v61 }
 0x137   :  { %v610_v3 = vadd.f32 1.0, %v2509_v62  ;;  %v2511_v8 = vpop.eup %2510 }
 0x138   :  { %v607_v6 = vmul.f32 0.5, %v606_v2  ;;  %v2513_v21 = vpop.eup %2512 }
 0x139   :  { %v611_v11 = vmul.f32 0.5, %v610_v3  ;;  %v615_v22 = vadd.f32 1.0, %v2513_v21 }
 0x13a   :  { %v618_v12 = vmul.f32 %v2511_v8, %v607_v6 }
 0x13b   :  { %v617_v15 = vmul.f32 0.0, %v611_v11  ;;  %v616_v24 = vmul.f32 0.5, %v615_v22 }
 0x13d   :  { %v2980_v19 = vadd.f32 %v618_v12, %v617_v15 }
 0x13f   :  { %2514 = vtanh.f32 %v2980_v19 }
 0x149   :  { %v2515_v25 = vpop.eup %2514 }
 0x14a   :  { %v621_v28 = vmul.f32 %v2515_v25, %v616_v24 }
 0x14c   :  { %622 = vst [vmem:[#allocation8] sm:$0xff] %v621_v28  ;;  %695 = vmatmul.mubr.f32.vlgmr.msra.gmra.mrb[2].mxu0 %v621_v28  ;;  %766 = vmatmul.mubr.f32.vlgmr.msra.gmra.mrb[2].mxu1 %v621_v28 }
 0x14d   :  { %2051 = vmatpush1.bf16.msra.mxu0 %v2782_v35  ;;  %2083 = vmatpush1.bf16.msra.mxu1 %v2785_v38 }
 0x14e   :  { %2053 = vmatprep.subr.bf16.mxu0 %v2788_v42  ;;  %2085 = vmatprep.subr.bf16.mxu1 %v2794_v47 }
 0x14f   :  { %867 = vmatprep.mubr.f32.mxu0 %v2708_v0  ;;  %938 = vmatprep.mubr.f32.mxu1 %v2708_v0 }
 0x151   :  { %2055 = vmatpush1.bf16.msra.mxu0 %v2798_v50  ;;  %2087 = vmatpush1.bf16.msra.mxu1 %v2802_v54 }
 0x152   :  { %2057 = vmatprep.subr.bf16.mxu0 %v2806_v57  ;;  %2089 = vmatprep.subr.bf16.mxu1 %v2810_v60 }
 0x155   :  { %2059 = vmatpush1.bf16.msra.mxu0 %v2817_v1  ;;  %2091 = vmatpush1.bf16.msra.mxu1 %v2821_v4 }
 0x156   :  { %2061 = vmatprep.subr.bf16.mxu0 %v2825_v7  ;;  %2093 = vmatprep.subr.bf16.mxu1 %v2829_v10 }
 0x159   :  { %2063 = vmatpush1.bf16.msra.mxu0 %v2836_v14  ;;  %2095 = vmatpush1.bf16.msra.mxu1 %v2840_v17 }
 0x15a   :  { %2065 = vmatprep.subr.bf16.mxu0 %v2844_v20  ;;  %2097 = vmatprep.subr.bf16.mxu1 %v2848_v23 }
 0x15d   :  { %2067 = vmatpush1.bf16.msra.mxu0 %v2855_v27  ;;  %2099 = vmatpush1.bf16.msra.mxu1 %v2859_v32 }
 0x15e   :  { %2069 = vmatprep.subr.bf16.mxu0 %v2863_v36  ;;  %2101 = vmatprep.subr.bf16.mxu1 %v2867_v40 }
 0x161   :  { %2071 = vmatpush1.bf16.msra.mxu0 %v2874_v45  ;;  %2103 = vmatpush1.bf16.msra.mxu1 %v2878_v49 }
 0x162   :  { %2073 = vmatprep.subr.bf16.mxu0 %v2882_v53  ;;  %2105 = vmatprep.subr.bf16.mxu1 %v2886_v58 }
 0x165   :  { %2075 = vmatpush1.bf16.msra.mxu0 %v2893_v63  ;;  %2107 = vmatpush1.bf16.msra.mxu1 %v2897_v5 }
 0x166   :  { %2077 = vmatprep.subr.bf16.mxu0 %v2901_v9  ;;  %2109 = vmatprep.subr.bf16.mxu1 %v2905_v13 }
 0x169   :  { %2079 = vmatpush1.bf16.msra.mxu0 %v2912_v16  ;;  %2111 = vmatpush1.bf16.msra.mxu1 %v2916_v18 }
 0x16a   :  { %2113 = vmatprep.subr.bf16.mxu0 %v2775_v29  ;;  %2145 = vmatprep.subr.bf16.mxu1 %v2777_v30 }
 0x21f   :  { %v696_v33 = vpop.f32.mrb[2].mxu0  ;;  %v767_v34 = vpop.f32.mrb[2].mxu1 }
 0x220   :  { %v2434_v39 = vadd.f32 %v696_v33, %v2968_v26  ;;  %v698_v41 = vpop.f32.mrb[3].mxu0  ;;  %v769_v43 = vpop.f32.mrb[3].mxu1  ;;  %v2450_v51 = vadd.f32 %v767_v34, %v2973_v37 }
 0x221   :  { %v2435_v44 = vadd.f32 %v698_v41, %v2970_v31  ;;  %v2451_v52 = vadd.f32 %v769_v43, %v2977_v55 }
 0x222   :  { %v776_v46 = vmul.f32 0.5, %v2434_v39 }
 0x223   :  { %v780_v48 = vmul.f32 0.5, %v2435_v44  ;;  %v785_v56 = vmul.f32 0.5, %v2451_v52 }
 0x224   :  { %2516 = vtanh.f32 %v776_v46 }
 0x225   :  { %2518 = vtanh.f32 %v780_v48 }
 0x226   :  { %2520 = vtanh.f32 %v2450_v51 }
 0x227   :  { %2522 = vtanh.f32 %v785_v56 }
 0x22e   :  { %v2517_v59 = vpop.eup %2516 }
 0x22f   :  { %v2519_v61 = vpop.eup %2518  ;;  %v778_v62 = vadd.f32 1.0, %v2517_v59 }
 0x230   :  { %v782_v2 = vadd.f32 1.0, %v2519_v61  ;;  %v2521_v6 = vpop.eup %2520 }
 0x231   :  { %v779_v3 = vmul.f32 0.5, %v778_v62  ;;  %v2523_v21 = vpop.eup %2522 }
 0x232   :  { %v783_v8 = vmul.f32 0.5, %v782_v2  ;;  %v787_v22 = vadd.f32 1.0, %v2523_v21 }
 0x233   :  { %v790_v11 = vmul.f32 %v2521_v6, %v779_v3 }
 0x234   :  { %v789_v12 = vmul.f32 %v783_v8, %v2980_v19  ;;  %v788_v24 = vmul.f32 0.5, %v787_v22 }
 0x236   :  { %v3022_v15 = vadd.f32 %v790_v11, %v789_v12 }
 0x238   :  { %2524 = vtanh.f32 %v3022_v15 }
 0x242   :  { %v2525_v25 = vpop.eup %2524 }
 0x243   :  { %v793_v28 = vmul.f32 %v2525_v25, %v788_v24 }
 0x245   :  { %795 = vst [vmem:[#allocation8 + $0x8] sm:$0xff] %v793_v28  ;;  %868 = vmatmul.mubr.f32.vlgmr.msra.gmra.mrb[4].mxu0 %v793_v28  ;;  %939 = vmatmul.mubr.f32.vlgmr.msra.gmra.mrb[4].mxu1 %v793_v28 }
 0x246   :  { %2115 = vmatpush1.bf16.msra.mxu0 %v2782_v35  ;;  %2147 = vmatpush1.bf16.msra.mxu1 %v2785_v38 }
 0x247   :  { %2117 = vmatprep.subr.bf16.mxu0 %v2788_v42  ;;  %2149 = vmatprep.subr.bf16.mxu1 %v2794_v47 }
 0x248   :  { %1040 = vmatprep.mubr.f32.mxu0 %v2708_v0  ;;  %1111 = vmatprep.mubr.f32.mxu1 %v2708_v0 }
 0x24a   :  { %2119 = vmatpush1.bf16.msra.mxu0 %v2798_v50  ;;  %2151 = vmatpush1.bf16.msra.mxu1 %v2802_v54 }
 0x24b   :  { %2121 = vmatprep.subr.bf16.mxu0 %v2806_v57  ;;  %2153 = vmatprep.subr.bf16.mxu1 %v2810_v60 }
 0x24e   :  { %2123 = vmatpush1.bf16.msra.mxu0 %v2817_v1  ;;  %2155 = vmatpush1.bf16.msra.mxu1 %v2821_v4 }
 0x24f   :  { %2125 = vmatprep.subr.bf16.mxu0 %v2825_v7  ;;  %2157 = vmatprep.subr.bf16.mxu1 %v2829_v10 }
 0x252   :  { %2127 = vmatpush1.bf16.msra.mxu0 %v2836_v14  ;;  %2159 = vmatpush1.bf16.msra.mxu1 %v2840_v17 }
 0x253   :  { %2129 = vmatprep.subr.bf16.mxu0 %v2844_v20  ;;  %2161 = vmatprep.subr.bf16.mxu1 %v2848_v23 }
 0x256   :  { %2131 = vmatpush1.bf16.msra.mxu0 %v2855_v27  ;;  %2163 = vmatpush1.bf16.msra.mxu1 %v2859_v32 }
 0x257   :  { %2133 = vmatprep.subr.bf16.mxu0 %v2863_v36  ;;  %2165 = vmatprep.subr.bf16.mxu1 %v2867_v40 }
 0x25a   :  { %2135 = vmatpush1.bf16.msra.mxu0 %v2874_v45  ;;  %2167 = vmatpush1.bf16.msra.mxu1 %v2878_v49 }
 0x25b   :  { %2137 = vmatprep.subr.bf16.mxu0 %v2882_v53  ;;  %2169 = vmatprep.subr.bf16.mxu1 %v2886_v58 }
 0x25e   :  { %2139 = vmatpush1.bf16.msra.mxu0 %v2893_v63  ;;  %2171 = vmatpush1.bf16.msra.mxu1 %v2897_v5 }
 0x25f   :  { %2141 = vmatprep.subr.bf16.mxu0 %v2901_v9  ;;  %2173 = vmatprep.subr.bf16.mxu1 %v2905_v13 }
 0x262   :  { %2143 = vmatpush1.bf16.msra.mxu0 %v2912_v16  ;;  %2175 = vmatpush1.bf16.msra.mxu1 %v2916_v18 }
 0x263   :  { %2177 = vmatprep.subr.bf16.mxu0 %v2775_v29  ;;  %2209 = vmatprep.subr.bf16.mxu1 %v2777_v30 }
 0x318   :  { %v869_v19 = vpop.f32.mrb[4].mxu0  ;;  %v940_v33 = vpop.f32.mrb[4].mxu1 }
 0x319   :  { %v2436_v34 = vadd.f32 %v869_v19, %v2968_v26  ;;  %v871_v39 = vpop.f32.mrb[5].mxu0  ;;  %v942_v41 = vpop.f32.mrb[5].mxu1  ;;  %v2452_v48 = vadd.f32 %v940_v33, %v2973_v37 }
 0x31a   :  { %v2437_v43 = vadd.f32 %v871_v39, %v2970_v31  ;;  %v2453_v51 = vadd.f32 %v942_v41, %v2977_v55 }
 0x31b   :  { %v949_v44 = vmul.f32 0.5, %v2436_v34 }
 0x31c   :  { %v953_v46 = vmul.f32 0.5, %v2437_v43  ;;  %v958_v52 = vmul.f32 0.5, %v2453_v51 }
 0x31d   :  { %2526 = vtanh.f32 %v949_v44 }
 0x31e   :  { %2528 = vtanh.f32 %v953_v46 }
 0x31f   :  { %2530 = vtanh.f32 %v2452_v48 }
 0x320   :  { %2532 = vtanh.f32 %v958_v52 }
 0x327   :  { %v2527_v56 = vpop.eup %2526 }
 0x328   :  { %v2529_v59 = vpop.eup %2528  ;;  %v951_v61 = vadd.f32 1.0, %v2527_v56 }
 0x329   :  { %v955_v62 = vadd.f32 1.0, %v2529_v59  ;;  %v2531_v3 = vpop.eup %2530 }
 0x32a   :  { %v952_v2 = vmul.f32 0.5, %v951_v61  ;;  %v2533_v21 = vpop.eup %2532 }
 0x32b   :  { %v956_v6 = vmul.f32 0.5, %v955_v62  ;;  %v960_v22 = vadd.f32 1.0, %v2533_v21 }
 0x32c   :  { %v963_v8 = vmul.f32 %v2531_v3, %v952_v2 }
 0x32d   :  { %v962_v11 = vmul.f32 %v956_v6, %v3022_v15  ;;  %v961_v24 = vmul.f32 0.5, %v960_v22 }
 0x32f   :  { %v3064_v12 = vadd.f32 %v963_v8, %v962_v11 }
 0x331   :  { %2534 = vtanh.f32 %v3064_v12 }
 0x33b   :  { %v2535_v25 = vpop.eup %2534 }
 0x33c   :  { %v966_v28 = vmul.f32 %v2535_v25, %v961_v24 }
 0x33e   :  { %968 = vst [vmem:[#allocation8 + $0x10] sm:$0xff] %v966_v28  ;;  %1041 = vmatmul.mubr.f32.vlgmr.msra.gmra.mrb[6].mxu0 %v966_v28  ;;  %1112 = vmatmul.mubr.f32.vlgmr.msra.gmra.mrb[6].mxu1 %v966_v28 }
 0x33f   :  { %2179 = vmatpush1.bf16.msra.mxu0 %v2782_v35  ;;  %2211 = vmatpush1.bf16.msra.mxu1 %v2785_v38 }
 0x340   :  { %2181 = vmatprep.subr.bf16.mxu0 %v2788_v42  ;;  %2213 = vmatprep.subr.bf16.mxu1 %v2794_v47 }
 0x341   :  { %1213 = vmatprep.mubr.f32.mxu0 %v2708_v0  ;;  %1284 = vmatprep.mubr.f32.mxu1 %v2708_v0 }
 0x343   :  { %2183 = vmatpush1.bf16.msra.mxu0 %v2798_v50  ;;  %2215 = vmatpush1.bf16.msra.mxu1 %v2802_v54 }
 0x344   :  { %2185 = vmatprep.subr.bf16.mxu0 %v2806_v57  ;;  %2217 = vmatprep.subr.bf16.mxu1 %v2810_v60 }
 0x347   :  { %2187 = vmatpush1.bf16.msra.mxu0 %v2817_v1  ;;  %2219 = vmatpush1.bf16.msra.mxu1 %v2821_v4 }
 0x348   :  { %2189 = vmatprep.subr.bf16.mxu0 %v2825_v7  ;;  %2221 = vmatprep.subr.bf16.mxu1 %v2829_v10 }
 0x34b   :  { %2191 = vmatpush1.bf16.msra.mxu0 %v2836_v14  ;;  %2223 = vmatpush1.bf16.msra.mxu1 %v2840_v17 }
 0x34c   :  { %2193 = vmatprep.subr.bf16.mxu0 %v2844_v20  ;;  %2225 = vmatprep.subr.bf16.mxu1 %v2848_v23 }
 0x34f   :  { %2195 = vmatpush1.bf16.msra.mxu0 %v2855_v27  ;;  %2227 = vmatpush1.bf16.msra.mxu1 %v2859_v32 }
 0x350   :  { %2197 = vmatprep.subr.bf16.mxu0 %v2863_v36  ;;  %2229 = vmatprep.subr.bf16.mxu1 %v2867_v40 }
 0x353   :  { %2199 = vmatpush1.bf16.msra.mxu0 %v2874_v45  ;;  %2231 = vmatpush1.bf16.msra.mxu1 %v2878_v49 }
 0x354   :  { %2201 = vmatprep.subr.bf16.mxu0 %v2882_v53  ;;  %2233 = vmatprep.subr.bf16.mxu1 %v2886_v58 }
 0x357   :  { %2203 = vmatpush1.bf16.msra.mxu0 %v2893_v63  ;;  %2235 = vmatpush1.bf16.msra.mxu1 %v2897_v5 }
 0x358   :  { %2205 = vmatprep.subr.bf16.mxu0 %v2901_v9  ;;  %2237 = vmatprep.subr.bf16.mxu1 %v2905_v13 }
 0x35b   :  { %2207 = vmatpush1.bf16.msra.mxu0 %v2912_v16  ;;  %2239 = vmatpush1.bf16.msra.mxu1 %v2916_v18 }
 0x35c   :  { %2241 = vmatprep.subr.bf16.mxu0 %v2775_v29  ;;  %2273 = vmatprep.subr.bf16.mxu1 %v2777_v30 }
 0x411   :  { %v1042_v15 = vpop.f32.mrb[6].mxu0  ;;  %v1113_v19 = vpop.f32.mrb[6].mxu1 }
 0x412   :  { %v2438_v33 = vadd.f32 %v1042_v15, %v2968_v26  ;;  %v1044_v34 = vpop.f32.mrb[7].mxu0  ;;  %v1115_v39 = vpop.f32.mrb[7].mxu1  ;;  %v2454_v46 = vadd.f32 %v1113_v19, %v2973_v37 }
 0x413   :  { %v2439_v41 = vadd.f32 %v1044_v34, %v2970_v31  ;;  %v2455_v48 = vadd.f32 %v1115_v39, %v2977_v55 }
 0x414   :  { %v1122_v43 = vmul.f32 0.5, %v2438_v33 }
 0x415   :  { %v1126_v44 = vmul.f32 0.5, %v2439_v41  ;;  %v1131_v51 = vmul.f32 0.5, %v2455_v48 }
 0x416   :  { %2536 = vtanh.f32 %v1122_v43 }
 0x417   :  { %2538 = vtanh.f32 %v1126_v44 }
 0x418   :  { %2540 = vtanh.f32 %v2454_v46 }
 0x419   :  { %2542 = vtanh.f32 %v1131_v51 }
 0x420   :  { %v2537_v52 = vpop.eup %2536 }
 0x421   :  { %v2539_v56 = vpop.eup %2538  ;;  %v1124_v59 = vadd.f32 1.0, %v2537_v52 }
 0x422   :  { %v1128_v61 = vadd.f32 1.0, %v2539_v56  ;;  %v2541_v2 = vpop.eup %2540 }
 0x423   :  { %v1125_v62 = vmul.f32 0.5, %v1124_v59  ;;  %v2543_v21 = vpop.eup %2542 }
 0x424   :  { %v1129_v3 = vmul.f32 0.5, %v1128_v61  ;;  %v1133_v22 = vadd.f32 1.0, %v2543_v21 }
 0x425   :  { %v1136_v6 = vmul.f32 %v2541_v2, %v1125_v62 }
 0x426   :  { %v1135_v8 = vmul.f32 %v1129_v3, %v3064_v12  ;;  %v1134_v24 = vmul.f32 0.5, %v1133_v22 }
 0x428   :  { %v3106_v11 = vadd.f32 %v1136_v6, %v1135_v8 }
 0x42a   :  { %2544 = vtanh.f32 %v3106_v11 }
 0x434   :  { %v2545_v25 = vpop.eup %2544 }
 0x435   :  { %v1139_v28 = vmul.f32 %v2545_v25, %v1134_v24 }
 0x437   :  { %1141 = vst [vmem:[#allocation8 + $0x18] sm:$0xff] %v1139_v28  ;;  %1214 = vmatmul.mubr.f32.vlgmr.msra.gmra.mrb[8].mxu0 %v1139_v28  ;;  %1285 = vmatmul.mubr.f32.vlgmr.msra.gmra.mrb[8].mxu1 %v1139_v28 }
 0x438   :  { %2243 = vmatpush1.bf16.msra.mxu0 %v2782_v35  ;;  %2275 = vmatpush1.bf16.msra.mxu1 %v2785_v38 }
 0x439   :  { %2245 = vmatprep.subr.bf16.mxu0 %v2788_v42  ;;  %2277 = vmatprep.subr.bf16.mxu1 %v2794_v47 }
 0x43a   :  { %1386 = vmatprep.mubr.f32.mxu0 %v2708_v0  ;;  %1457 = vmatprep.mubr.f32.mxu1 %v2708_v0 }
 0x43c   :  { %2247 = vmatpush1.bf16.msra.mxu0 %v2798_v50  ;;  %2279 = vmatpush1.bf16.msra.mxu1 %v2802_v54 }
 0x43d   :  { %2249 = vmatprep.subr.bf16.mxu0 %v2806_v57  ;;  %2281 = vmatprep.subr.bf16.mxu1 %v2810_v60 }
 0x440   :  { %2251 = vmatpush1.bf16.msra.mxu0 %v2817_v1  ;;  %2283 = vmatpush1.bf16.msra.mxu1 %v2821_v4 }
 0x441   :  { %2253 = vmatprep.subr.bf16.mxu0 %v2825_v7  ;;  %2285 = vmatprep.subr.bf16.mxu1 %v2829_v10 }
 0x444   :  { %2255 = vmatpush1.bf16.msra.mxu0 %v2836_v14  ;;  %2287 = vmatpush1.bf16.msra.mxu1 %v2840_v17 }
 0x445   :  { %2257 = vmatprep.subr.bf16.mxu0 %v2844_v20  ;;  %2289 = vmatprep.subr.bf16.mxu1 %v2848_v23 }
 0x448   :  { %2259 = vmatpush1.bf16.msra.mxu0 %v2855_v27  ;;  %2291 = vmatpush1.bf16.msra.mxu1 %v2859_v32 }
 0x449   :  { %2261 = vmatprep.subr.bf16.mxu0 %v2863_v36  ;;  %2293 = vmatprep.subr.bf16.mxu1 %v2867_v40 }
 0x44c   :  { %2263 = vmatpush1.bf16.msra.mxu0 %v2874_v45  ;;  %2295 = vmatpush1.bf16.msra.mxu1 %v2878_v49 }
 0x44d   :  { %2265 = vmatprep.subr.bf16.mxu0 %v2882_v53  ;;  %2297 = vmatprep.subr.bf16.mxu1 %v2886_v58 }
 0x450   :  { %2267 = vmatpush1.bf16.msra.mxu0 %v2893_v63  ;;  %2299 = vmatpush1.bf16.msra.mxu1 %v2897_v5 }
 0x451   :  { %2269 = vmatprep.subr.bf16.mxu0 %v2901_v9  ;;  %2301 = vmatprep.subr.bf16.mxu1 %v2905_v13 }
 0x454   :  { %2271 = vmatpush1.bf16.msra.mxu0 %v2912_v16  ;;  %2303 = vmatpush1.bf16.msra.mxu1 %v2916_v18 }
 0x455   :  { %2305 = vmatprep.subr.bf16.mxu0 %v2775_v29  ;;  %2337 = vmatprep.subr.bf16.mxu1 %v2777_v30 }
 0x50a   :  { %v1215_v12 = vpop.f32.mrb[8].mxu0  ;;  %v1286_v15 = vpop.f32.mrb[8].mxu1 }
 0x50b   :  { %v2440_v19 = vadd.f32 %v1215_v12, %v2968_v26  ;;  %v1217_v33 = vpop.f32.mrb[9].mxu0  ;;  %v1288_v34 = vpop.f32.mrb[9].mxu1  ;;  %v2456_v44 = vadd.f32 %v1286_v15, %v2973_v37 }
 0x50c   :  { %v2441_v39 = vadd.f32 %v1217_v33, %v2970_v31  ;;  %v2457_v46 = vadd.f32 %v1288_v34, %v2977_v55 }
 0x50d   :  { %v1295_v41 = vmul.f32 0.5, %v2440_v19 }
 0x50e   :  { %v1299_v43 = vmul.f32 0.5, %v2441_v39  ;;  %v1304_v48 = vmul.f32 0.5, %v2457_v46 }
 0x50f   :  { %2546 = vtanh.f32 %v1295_v41 }
 0x510   :  { %2548 = vtanh.f32 %v1299_v43 }
 0x511   :  { %2550 = vtanh.f32 %v2456_v44 }
 0x512   :  { %2552 = vtanh.f32 %v1304_v48 }
 0x519   :  { %v2547_v51 = vpop.eup %2546 }
 0x51a   :  { %v2549_v52 = vpop.eup %2548  ;;  %v1297_v56 = vadd.f32 1.0, %v2547_v51 }
 0x51b   :  { %v1301_v59 = vadd.f32 1.0, %v2549_v52  ;;  %v2551_v62 = vpop.eup %2550 }
 0x51c   :  { %v1298_v61 = vmul.f32 0.5, %v1297_v56  ;;  %v2553_v21 = vpop.eup %2552 }
 0x51d   :  { %v1302_v2 = vmul.f32 0.5, %v1301_v59  ;;  %v1306_v22 = vadd.f32 1.0, %v2553_v21 }
 0x51e   :  { %v1309_v3 = vmul.f32 %v2551_v62, %v1298_v61 }
 0x51f   :  { %v1308_v6 = vmul.f32 %v1302_v2, %v3106_v11  ;;  %v1307_v24 = vmul.f32 0.5, %v1306_v22 }
 0x521   :  { %v3148_v8 = vadd.f32 %v1309_v3, %v1308_v6 }
 0x523   :  { %2554 = vtanh.f32 %v3148_v8 }
 0x52d   :  { %v2555_v25 = vpop.eup %2554 }
 0x52e   :  { %v1312_v28 = vmul.f32 %v2555_v25, %v1307_v24 }
 0x530   :  { %1314 = vst [vmem:[#allocation8 + $0x20] sm:$0xff] %v1312_v28  ;;  %1387 = vmatmul.mubr.f32.vlgmr.msra.gmra.mrb[10].mxu0 %v1312_v28  ;;  %1458 = vmatmul.mubr.f32.vlgmr.msra.gmra.mrb[10].mxu1 %v1312_v28 }
 0x531   :  { %2307 = vmatpush1.bf16.msra.mxu0 %v2782_v35  ;;  %2339 = vmatpush1.bf16.msra.mxu1 %v2785_v38 }
 0x532   :  { %2309 = vmatprep.subr.bf16.mxu0 %v2788_v42  ;;  %2341 = vmatprep.subr.bf16.mxu1 %v2794_v47 }
 0x533   :  { %1559 = vmatprep.mubr.f32.mxu0 %v2708_v0  ;;  %1630 = vmatprep.mubr.f32.mxu1 %v2708_v0 }
 0x535   :  { %2311 = vmatpush1.bf16.msra.mxu0 %v2798_v50  ;;  %2343 = vmatpush1.bf16.msra.mxu1 %v2802_v54 }
 0x536   :  { %2313 = vmatprep.subr.bf16.mxu0 %v2806_v57  ;;  %2345 = vmatprep.subr.bf16.mxu1 %v2810_v60 }
 0x539   :  { %2315 = vmatpush1.bf16.msra.mxu0 %v2817_v1  ;;  %2347 = vmatpush1.bf16.msra.mxu1 %v2821_v4 }
 0x53a   :  { %2317 = vmatprep.subr.bf16.mxu0 %v2825_v7  ;;  %2349 = vmatprep.subr.bf16.mxu1 %v2829_v10 }
 0x53d   :  { %2319 = vmatpush1.bf16.msra.mxu0 %v2836_v14  ;;  %2351 = vmatpush1.bf16.msra.mxu1 %v2840_v17 }
 0x53e   :  { %2321 = vmatprep.subr.bf16.mxu0 %v2844_v20  ;;  %2353 = vmatprep.subr.bf16.mxu1 %v2848_v23 }
 0x541   :  { %2323 = vmatpush1.bf16.msra.mxu0 %v2855_v27  ;;  %2355 = vmatpush1.bf16.msra.mxu1 %v2859_v32 }
 0x542   :  { %2325 = vmatprep.subr.bf16.mxu0 %v2863_v36  ;;  %2357 = vmatprep.subr.bf16.mxu1 %v2867_v40 }
 0x545   :  { %2327 = vmatpush1.bf16.msra.mxu0 %v2874_v45  ;;  %2359 = vmatpush1.bf16.msra.mxu1 %v2878_v49 }
 0x546   :  { %2329 = vmatprep.subr.bf16.mxu0 %v2882_v53  ;;  %2361 = vmatprep.subr.bf16.mxu1 %v2886_v58 }
 0x549   :  { %2331 = vmatpush1.bf16.msra.mxu0 %v2893_v63  ;;  %2363 = vmatpush1.bf16.msra.mxu1 %v2897_v5 }
 0x54a   :  { %2333 = vmatprep.subr.bf16.mxu0 %v2901_v9  ;;  %2365 = vmatprep.subr.bf16.mxu1 %v2905_v13 }
 0x54d   :  { %2335 = vmatpush1.bf16.msra.mxu0 %v2912_v16  ;;  %2367 = vmatpush1.bf16.msra.mxu1 %v2916_v18 }
 0x54e   :  { %2369 = vmatprep.subr.bf16.mxu0 %v2775_v29  ;;  %2401 = vmatprep.subr.bf16.mxu1 %v2777_v30 }
 0x603   :  { %v1388_v11 = vpop.f32.mrb[10].mxu0  ;;  %v1459_v12 = vpop.f32.mrb[10].mxu1 }
 0x604   :  { %v2442_v15 = vadd.f32 %v1388_v11, %v2968_v26  ;;  %v1390_v19 = vpop.f32.mrb[11].mxu0  ;;  %v1461_v33 = vpop.f32.mrb[11].mxu1  ;;  %v2458_v43 = vadd.f32 %v1459_v12, %v2973_v37 }
 0x605   :  { %v2443_v34 = vadd.f32 %v1390_v19, %v2970_v31  ;;  %v2459_v44 = vadd.f32 %v1461_v33, %v2977_v55 }
 0x606   :  { %v1468_v39 = vmul.f32 0.5, %v2442_v15 }
 0x607   :  { %v1472_v41 = vmul.f32 0.5, %v2443_v34  ;;  %v1477_v29 = vmul.f32 0.5, %v2459_v44 }
 0x608   :  { %2556 = vtanh.f32 %v1468_v39 }
 0x609   :  { %2558 = vtanh.f32 %v1472_v41 }
 0x60a   :  { %2560 = vtanh.f32 %v2458_v43 }
 0x60b   :  { %2562 = vtanh.f32 %v1477_v29 }
 0x612   :  { %v2557_v46 = vpop.eup %2556 }
 0x613   :  { %v2559_v30 = vpop.eup %2558  ;;  %v1470_v48 = vadd.f32 1.0, %v2557_v46 }
 0x614   :  { %v1474_v51 = vadd.f32 1.0, %v2559_v30  ;;  %v2561_v56 = vpop.eup %2560 }
 0x615   :  { %v1471_v52 = vmul.f32 0.5, %v1470_v48  ;;  %v2563_v3 = vpop.eup %2562 }
 0x616   :  { %v1475_v59 = vmul.f32 0.5, %v1474_v51  ;;  %v1479_v6 = vadd.f32 1.0, %v2563_v3 }
 0x617   :  { %v1482_v61 = vmul.f32 %v2561_v56, %v1471_v52 }
 0x618   :  { %v1481_v62 = vmul.f32 %v1475_v59, %v3148_v8  ;;  %v1480_v21 = vmul.f32 0.5, %v1479_v6 }
 0x61a   :  { %v3190_v2 = vadd.f32 %v1482_v61, %v1481_v62 }
 0x61c   :  { %2564 = vtanh.f32 %v3190_v2 }
 0x626   :  { %v2565_v22 = vpop.eup %2564 }
 0x627   :  { %v1485_v24 = vmul.f32 %v2565_v22, %v1480_v21 }
 0x629   :  { %1487 = vst [vmem:[#allocation8 + $0x28] sm:$0xff] %v1485_v24  ;;  %1560 = vmatmul.mubr.f32.vlgmr.msra.gmra.mrb[12].mxu0 %v1485_v24  ;;  %1631 = vmatmul.mubr.f32.vlgmr.msra.gmra.mrb[12].mxu1 %v1485_v24 }
 0x62a   :  { %2371 = vmatpush1.bf16.msra.mxu0 %v2782_v35  ;;  %2403 = vmatpush1.bf16.msra.mxu1 %v2785_v38 }
 0x62b   :  { %2373 = vmatprep.subr.bf16.mxu0 %v2788_v42  ;;  %2405 = vmatprep.subr.bf16.mxu1 %v2794_v47 }
 0x62c   :  { %1732 = vmatprep.mubr.f32.mxu0 %v2708_v0  ;;  %1803 = vmatprep.mubr.f32.mxu1 %v2708_v0 }
 0x62e   :  { %2375 = vmatpush1.bf16.msra.mxu0 %v2798_v50  ;;  %2407 = vmatpush1.bf16.msra.mxu1 %v2802_v54 }
 0x62f   :  { %2377 = vmatprep.subr.bf16.mxu0 %v2806_v57  ;;  %2409 = vmatprep.subr.bf16.mxu1 %v2810_v60 }
 0x632   :  { %2379 = vmatpush1.bf16.msra.mxu0 %v2817_v1  ;;  %2411 = vmatpush1.bf16.msra.mxu1 %v2821_v4 }
 0x633   :  { %2381 = vmatprep.subr.bf16.mxu0 %v2825_v7  ;;  %2413 = vmatprep.subr.bf16.mxu1 %v2829_v10 }
 0x636   :  { %2383 = vmatpush1.bf16.msra.mxu0 %v2836_v14  ;;  %2415 = vmatpush1.bf16.msra.mxu1 %v2840_v17 }
 0x637   :  { %2385 = vmatprep.subr.bf16.mxu0 %v2844_v20  ;;  %2417 = vmatprep.subr.bf16.mxu1 %v2848_v23 }
 0x63a   :  { %2387 = vmatpush1.bf16.msra.mxu0 %v2855_v27  ;;  %2419 = vmatpush1.bf16.msra.mxu1 %v2859_v32 }
 0x63b   :  { %2389 = vmatprep.subr.bf16.mxu0 %v2863_v36  ;;  %2421 = vmatprep.subr.bf16.mxu1 %v2867_v40 }
 0x63e   :  { %2391 = vmatpush1.bf16.msra.mxu0 %v2874_v45  ;;  %2423 = vmatpush1.bf16.msra.mxu1 %v2878_v49 }
 0x63f   :  { %2393 = vmatprep.subr.bf16.mxu0 %v2882_v53  ;;  %2425 = vmatprep.subr.bf16.mxu1 %v2886_v58 }
 0x642   :  { %2395 = vmatpush1.bf16.msra.mxu0 %v2893_v63  ;;  %2427 = vmatpush1.bf16.msra.mxu1 %v2897_v5 }
 0x643   :  { %2397 = vmatprep.subr.bf16.mxu0 %v2901_v9  ;;  %2429 = vmatprep.subr.bf16.mxu1 %v2905_v13 }
 0x646   :  { %2399 = vmatpush1.bf16.msra.mxu0 %v2912_v16  ;;  %2431 = vmatpush1.bf16.msra.mxu1 %v2916_v18 }
 0x6fc   :  { %v1561_v0 = vpop.f32.mrb[12].mxu0  ;;  %v1632_v35 = vpop.f32.mrb[12].mxu1 }
 0x6fd   :  { %v2444_v38 = vadd.f32 %v1561_v0, %v2968_v26  ;;  %v1563_v42 = vpop.f32.mrb[13].mxu0  ;;  %v1634_v47 = vpop.f32.mrb[13].mxu1  ;;  %v2460_v60 = vadd.f32 %v1632_v35, %v2973_v37 }
 0x6fe   :  { %v2445_v50 = vadd.f32 %v1563_v42, %v2970_v31  ;;  %v2461_v1 = vadd.f32 %v1634_v47, %v2977_v55 }
 0x6ff   :  { %v1641_v54 = vmul.f32 0.5, %v2444_v38 }
 0x700   :  { %v1645_v57 = vmul.f32 0.5, %v2445_v50  ;;  %v1650_v4 = vmul.f32 0.5, %v2461_v1 }
 0x701   :  { %2566 = vtanh.f32 %v1641_v54 }
 0x702   :  { %2568 = vtanh.f32 %v1645_v57 }
 0x703   :  { %2570 = vtanh.f32 %v2460_v60 }
 0x704   :  { %2572 = vtanh.f32 %v1650_v4 }
 0x70b   :  { %v2567_v7 = vpop.eup %2566 }
 0x70c   :  { %v2569_v10 = vpop.eup %2568  ;;  %v1643_v14 = vadd.f32 1.0, %v2567_v7 }
 0x70d   :  { %v1647_v17 = vadd.f32 1.0, %v2569_v10  ;;  %v2571_v23 = vpop.eup %2570 }
 0x70e   :  { %v1644_v20 = vmul.f32 0.5, %v1643_v14  ;;  %v2573_v45 = vpop.eup %2572 }
 0x70f   :  { %v1648_v27 = vmul.f32 0.5, %v1647_v17  ;;  %v1652_v49 = vadd.f32 1.0, %v2573_v45 }
 0x710   :  { %v1655_v32 = vmul.f32 %v2571_v23, %v1644_v20 }
 0x711   :  { %v1654_v36 = vmul.f32 %v1648_v27, %v3190_v2  ;;  %v1653_v53 = vmul.f32 0.5, %v1652_v49 }
 0x713   :  { %v1656_v40 = vadd.f32 %v1655_v32, %v1654_v36 }
 0x715   :  { %2574 = vtanh.f32 %v1656_v40 }
 0x71f   :  { %v2575_v58 = vpop.eup %2574 }
 0x720   :  { %v1658_v63 = vmul.f32 %v2575_v58, %v1653_v53 }
 0x722   :  { %1660 = vst [vmem:[#allocation8 + $0x30] sm:$0xff] %v1658_v63  ;;  %1733 = vmatmul.mubr.f32.vlgmr.msra.gmra.mrb[14].mxu0 %v1658_v63  ;;  %1804 = vmatmul.mubr.f32.vlgmr.msra.gmra.mrb[14].mxu1 %v1658_v63 }
 0x7f5   :  { %v1734_v5 = vpop.f32.mrb[14].mxu0  ;;  %v1805_v9 = vpop.f32.mrb[14].mxu1 }
 0x7f6   :  { %v2446_v13 = vadd.f32 %v1734_v5, %v2968_v26  ;;  %v1736_v16 = vpop.f32.mrb[15].mxu0  ;;  %v1807_v18 = vpop.f32.mrb[15].mxu1  ;;  %v2462_v11 = vadd.f32 %v1805_v9, %v2973_v37 }
 0x7f7   :  { %v2447_v8 = vadd.f32 %v1736_v16, %v2970_v31  ;;  %v2463_v12 = vadd.f32 %v1807_v18, %v2977_v55 }
 0x7f8   :  { %v1814_v25 = vmul.f32 0.5, %v2446_v13 }
 0x7f9   :  { %v1818_v28 = vmul.f32 0.5, %v2447_v8  ;;  %v1823_v15 = vmul.f32 0.5, %v2463_v12 }
 0x7fa   :  { %2576 = vtanh.f32 %v1814_v25 }
 0x7fb   :  { %2578 = vtanh.f32 %v1818_v28 }
 0x7fc   :  { %2580 = vtanh.f32 %v2462_v11 }
 0x7fd   :  { %2582 = vtanh.f32 %v1823_v15 }
 0x804   :  { %v2577_v19 = vpop.eup %2576 }
 0x805   :  { %v2579_v33 = vpop.eup %2578  ;;  %v1816_v34 = vadd.f32 1.0, %v2577_v19 }
 0x806   :  { %v1820_v39 = vadd.f32 1.0, %v2579_v33  ;;  %v2581_v41 = vpop.eup %2580 }
 0x807   :  { %v1817_v26 = vmul.f32 0.5, %v1816_v34  ;;  %v2583_v46 = vpop.eup %2582 }
 0x808   :  { %v1821_v43 = vmul.f32 0.5, %v1820_v39  ;;  %v1825_v37 = vadd.f32 1.0, %v2583_v46 }
 0x809   :  { %v1828_v44 = vmul.f32 %v2581_v41, %v1817_v26 }
 0x80a   :  { %v1827_v31 = vmul.f32 %v1821_v43, %v1656_v40  ;;  %v1826_v55 = vmul.f32 0.5, %v1825_v37 }
 0x80c   :  { %v1829_v29 = vadd.f32 %v1828_v44, %v1827_v31 }
 0x80e   :  { %2584 = vtanh.f32 %v1829_v29  ;;  %1835 = vst [vmem:[#allocation11] sm:$0xff] %v1829_v29 }
 0x818   :  { %v2585_v30 = vpop.eup %2584 }
 0x819   :  { %v1831_v48 = vmul.f32 %v2585_v30, %v1826_v55 }
 0x81b   :  { %1833 = vst [vmem:[#allocation8 + $0x38] sm:$0xff] %v1831_v48  ;;  %1834 = vst [vmem:[#allocation9] sm:$0xff] %v1831_v48 }
 0x81c   :  { %2641 = shalt.err (!%p2638_p6)
}
 0x81d   :  { %s2642_s21 = scalar_lea.hbm %s3289_s5, 128 }
 0x81e   :  { %p2643_p7 = scmp.ne.s32.totalorder %s3289_s5, %s2642_s21  ;;  %p2646_p8 = scmp.lt.u32.totalorder %s2642_s21, %s3289_s5 }
 0x820   :  { %p2648_p9 = pnand %p2646_p8, %p2643_p7 }
 0x822   :  { %2651 = shalt.err (!%p2648_p9)
}
 0x823   :  { %1857 = dma.vmem_to_hbm [thread:$0]  %s1855_s14, 128, %s3289_s5, [#allocation10]  }
 0x824   :  { %s2652_s27 = scalar_lea.vmem %s3234_s16, 1024  ;;  %p2657_p11 = scmp.lt.s32.totalorder %s3234_s16, %s3234_s16 }
 0x825   :  { %p2653_p10 = scmp.ne.s32.totalorder %s3234_s16, %s2652_s27  ;;  %p2658_p12 = scmp.lt.s32.totalorder %s2652_s27, %s2652_s27 }
 0x827   :  { %p2659_p13 = por %p2658_p12, %p2657_p11 }
 0x829   :  { %p2660_p0 = pnand %p2659_p13, %p2653_p10 }
 0x82b   :  { %2663 = shalt.err (!%p2660_p0)
}
 0x82c   :  { %s2664_s30 = scalar_lea.hbm %s3288_s4, 1024 }
 0x82d   :  { %p2665_p1 = scmp.ne.s32.totalorder %s3288_s4, %s2664_s30  ;;  %p2668_p2 = scmp.lt.u32.totalorder %s2664_s30, %s3288_s4 }
 0x82f   :  { %p2670_p3 = pnand %p2668_p2, %p2665_p1 }
 0x831   :  { %2673 = shalt.err (!%p2670_p3)
}
 0x832   :  { %s2712_s5 = smov 128   ;;  %s2713_s11 = smov 8  }
 0x833   :  { %1847 = dma.vmem_to_hbm [thread:$0]  %s3234_s16, 1024, %s3288_s4, [#allocation5], %s2712_s5, %s2712_s5, %s2713_s11  }
 0x834   :  { %s2674_s13 = scalar_lea.vmem %s3236_s18, 128  ;;  %p2679_p5 = scmp.lt.s32.totalorder %s3236_s18, %s3236_s18 }
 0x835   :  { %p2675_p4 = scmp.ne.s32.totalorder %s3236_s18, %s2674_s13  ;;  %p2680_p6 = scmp.lt.s32.totalorder %s2674_s13, %s2674_s13 }
 0x837   :  { %p2681_p7 = por %p2680_p6, %p2679_p5 }
 0x839   :  { %p2682_p8 = pnand %p2681_p7, %p2675_p4 }
 0x83b   :  { %2685 = shalt.err (!%p2682_p8)
}
 0x83c   :  { %s2686_s15 = scalar_lea.hbm %s3290_s6, 128 }
 0x83d   :  { %p2687_p9 = scmp.ne.s32.totalorder %s3290_s6, %s2686_s15  ;;  %p2690_p10 = scmp.lt.u32.totalorder %s2686_s15, %s3290_s6 }
 0x83f   :  { %p2692_p11 = pnand %p2690_p10, %p2687_p9 }
 0x841   :  { %2695 = shalt.err (!%p2692_p11)
}
 0x842   :  { %1867 = dma.vmem_to_hbm [thread:$0]  %s3236_s18, 128, %s3290_s6, [#allocation10]  }
 0x843   :  { %2700 = dma.done.wait [#allocation5], 1024  }
 0x844   :  { %2701 = vsyncadd [#allocation5], 4294966272 }
 0x845   :  { %2702 = dma.done.wait [#allocation10], 256  }
 0x846   :  { %2703 = vsyncadd [#allocation10], 4294967040 }
 0x847   :  { %1877 = vsyncpa [#allocation4], 1 }
 0x848   :  { %1878 = vsyncpa [#allocation7], 1 }
 0x849   :  { %1879 = vsyncpa [#allocation5], 1 }
 0x84a   :  { %1880 = vsyncpa [#allocation10], 1 }

</bundles_post_ra>
